<compile_context>
chip_gen: v6e
topology: v6e:2x2x1
jax: 0.10.0
libtpu: 0.0.40
codegen_flags: <defaults>
</compile_context>

<pallas_src>
import functools
import math

import jax
import jax.numpy as jnp
from jax.experimental import pallas as pl
from jax.experimental.pallas import tpu as pltpu

# ----------------------------- model config ---------------------------------
D_MODEL = 128          # input_size (small, lane-aligned demo size)
N_LAYERS = 2           # encoder_layers
N_HEADS = 4            # attention_heads
HEAD_DIM = D_MODEL // N_HEADS
SEQ = 8
BATCH = 2
EPS = 1e-5

# rows inside the packed per-layer vector tensor (L, 10, D)
_QB, _KB, _VB, _OB, _L1B, _L2B, _N1W, _N1B, _N2W, _N2B = range(10)
# rows inside the packed head vector tensor (8, D)
_FNW, _FNB, _K1B, _K2W, _K2B = range(5)


def _layernorm(h, w, b):
    mu = jnp.mean(h, axis=-1, keepdims=True)
    var = jnp.mean((h - mu) ** 2, axis=-1, keepdims=True)
    return (h - mu) * jax.lax.rsqrt(var + EPS) * w + b


def transformer_kernel(
    x_ref,         # (nb*S, D)     f32   fused rows for this grid step
    layer_w_ref,   # (L, D, 6D)    bf16  [Wqkv^T | Wo^T | W1^T | W2^T]
    layer_v_ref,   # (L, 10, D)    f32   per-layer biases + norm params
    k1_w_ref,      # (D, D)        bf16  k1 weight, pre-transposed
    head_v_ref,    # (8, D)        f32   fnorm_w/b, k1_b, k2_w row, k2_b
    o_ref,         # (nb*S, 1)     f32
    *,
    nb,            # static: batches handled by this grid step
):
    S, D, H, hd = SEQ, D_MODEL, N_HEADS, HEAD_DIM
    rows = nb * S

    x = x_ref[...]  # (rows, D) f32, rows ordered (b major, s minor)

    for l in range(N_LAYERS):
        vecs = layer_v_ref[l]                     # (10, D) f32

        # ---- multi-head self-attention (post-norm encoder layer) ----
        wqkv = layer_w_ref[l, :, 0 * D:3 * D]     # (D, 3D) bf16
        qkv = jnp.dot(x.astype(jnp.bfloat16), wqkv,
                      preferred_element_type=jnp.float32)     # (rows, 3D) f32

        # 1/sqrt(head_dim) is folded into Wq and the q bias at pack time.
        q = (qkv[:, 0 * D:1 * D] + vecs[_QB:_QB + 1, :]).reshape(nb, S, D)
        k = (qkv[:, 1 * D:2 * D] + vecs[_KB:_KB + 1, :]).reshape(nb, S, D)
        v = (qkv[:, 2 * D:3 * D] + vecs[_VB:_VB + 1, :]).reshape(nb, S, D)

        # Split heads into the einsum batch dim (head-major) via static lane
        # slices stacked along axis 0 — cheap tile stacking, avoids a
        # lane-splitting reshape.  bf16 operands, f32 accumulation on the MXU.
        def split_heads(t):
            return jnp.concatenate(
                [t[:, :, h * hd:(h + 1) * hd] for h in range(H)], axis=0
            ).astype(jnp.bfloat16)                 # (H*nb, S, hd) bf16

        qh = split_heads(q)
        kh = split_heads(k)
        vh = split_heads(v)

        # ONE batched score einsum + ONE batched PV einsum for all heads/batches.
        s = jnp.einsum('bqd,bkd->bqk', qh, kh,
                       preferred_element_type=jnp.float32)    # (H*nb, S, S) f32
        s = s - jnp.max(s, axis=-1, keepdims=True)
        e = jnp.exp(s)
        p = e * pl.reciprocal(jnp.sum(e, axis=-1, keepdims=True), approx=True)
        av = jnp.einsum('bqk,bkd->bqd', p.astype(jnp.bfloat16), vh,
                        preferred_element_type=jnp.float32)   # (H*nb, S, hd) f32

        # Merge heads back to (rows, D): head h occupies lanes [h*hd:(h+1)*hd].
        attn = jnp.concatenate(
            [av[h * nb:(h + 1) * nb] for h in range(H)], axis=-1
        ).reshape(rows, D)

        wo = layer_w_ref[l, :, 3 * D:4 * D]        # (D, D) bf16
        attn = jnp.dot(attn.astype(jnp.bfloat16), wo,
                       preferred_element_type=jnp.float32) + vecs[_OB:_OB + 1, :]
        x = _layernorm(x + attn, vecs[_N1W:_N1W + 1, :], vecs[_N1B:_N1B + 1, :])

        # ---- feed-forward (d_ff == d_model in this module) ----
        w1 = layer_w_ref[l, :, 4 * D:5 * D]
        w2 = layer_w_ref[l, :, 5 * D:6 * D]
        ff = jnp.dot(x.astype(jnp.bfloat16), w1,
                     preferred_element_type=jnp.float32) + vecs[_L1B:_L1B + 1, :]
        ff = jnp.maximum(ff, 0.0)
        ff = jnp.dot(ff.astype(jnp.bfloat16), w2,
                     preferred_element_type=jnp.float32) + vecs[_L2B:_L2B + 1, :]
        x = _layernorm(x + ff, vecs[_N2W:_N2W + 1, :], vecs[_N2B:_N2B + 1, :])

    hv = head_v_ref[...]                           # (8, D) f32
    fnw = hv[_FNW:_FNW + 1, :]
    fnb = hv[_FNB:_FNB + 1, :]

    # final encoder norm (shared LayerNorm module)
    x = _layernorm(x, fnw, fnb)

    # head: k1 -> relu -> (dropout=id) -> layer_norm(shared) -> k2 -> sigmoid
    y = jnp.dot(x.astype(jnp.bfloat16), k1_w_ref[...],
                preferred_element_type=jnp.float32) + hv[_K1B:_K1B + 1, :]
    y = jnp.maximum(y, 0.0)
    y = _layernorm(y, fnw, fnb)
    # k2: (D -> 1) as a VPU multiply + cross-lane sum instead of an N=1 matmul
    y = jnp.sum(y * hv[_K2W:_K2W + 1, :], axis=-1, keepdims=True) \
        + hv[_K2B:_K2B + 1, 0:1]
    o_ref[...] = jax.nn.sigmoid(y)                 # (rows, 1)


def _v7x_detected():
    """True only on v7x-class chips (2 TensorCores per chip)."""
    try:
        kind = jax.devices()[0].device_kind.lower()
    except Exception:
        return False
    return "v7" in kind


def transformer_forward(x_sbd, packed):
    """x_sbd: (seq, batch, d_model) f32 -> (seq, batch, 1) f32."""
    S, B, D = x_sbd.shape
    assert S == SEQ and B == BATCH and D == D_MODEL
    x_fused = jnp.transpose(x_sbd, (1, 0, 2)).reshape(B * S, D)  # rows = b*S + s

    layer_w = packed["layer_w"]
    layer_v = packed["layer_v"]
    k1_w = packed["k1_w"]
    head_v = packed["head_v"]

    # v7x: split grid over batch ("parallel") to engage both TensorCores.
    # v5e/v6e: single fused grid step (extra steps only add per-step overhead).
    n_blocks = 2 if (_v7x_detected() and B % 2 == 0) else 1
    nb = B // n_blocks
    rows = nb * S

    kernel = functools.partial(transformer_kernel, nb=nb)

    out = pl.pallas_call(
        kernel,
        out_shape=jax.ShapeDtypeStruct((B * S, 1), jnp.float32),
        grid=(n_blocks,),
        in_specs=[
            pl.BlockSpec((rows, D), lambda i: (i, 0)),
            # Packed weights are ~0.45 MB -> keep them whole-array resident.
            # TODO(synk): if N_LAYERS/D_MODEL grow, switch layer_w to a per-layer
            # BlockSpec((1, D, 6*D)) on an "arbitrary" layer grid axis so VMEM
            # stays bounded on v7x (64 MiB physical / 32 MiB scoped default).
            pl.BlockSpec(layer_w.shape, lambda i: (0, 0, 0)),
            pl.BlockSpec(layer_v.shape, lambda i: (0, 0, 0)),
            pl.BlockSpec(k1_w.shape, lambda i: (0, 0)),
            pl.BlockSpec(head_v.shape, lambda i: (0, 0)),
        ],
        out_specs=pl.BlockSpec((rows, 1), lambda i: (i, 0)),
        compiler_params=pltpu.CompilerParams(
            dimension_semantics=("parallel",)),
    )(x_fused, layer_w, layer_v, k1_w, head_v)

    return jnp.transpose(out.reshape(B, S, 1), (1, 0, 2))  # (S, B, 1)


def init_params(key):
    """Deterministic synthetic parameters in PyTorch nn.Module layout."""
    L, D = N_LAYERS, D_MODEL
    ks = jax.random.split(key, 12)

    def u(k, shape, scale=0.08):
        return jax.random.uniform(k, shape, jnp.float32, -scale, scale)

    return {
        "in_proj_w": u(ks[0], (L, 3 * D, D)),
        "in_proj_b": u(ks[1], (L, 3 * D)),
        "out_proj_w": u(ks[2], (L, D, D)),
        "out_proj_b": u(ks[3], (L, D)),
        "lin1_w": u(ks[4], (L, D, D)),
        "lin1_b": u(ks[5], (L, D)),
        "lin2_w": u(ks[6], (L, D, D)),
        "lin2_b": u(ks[7], (L, D)),
        "norm1_w": jnp.ones((L, D), jnp.float32),
        "norm1_b": jnp.zeros((L, D), jnp.float32),
        "norm2_w": jnp.ones((L, D), jnp.float32),
        "norm2_b": jnp.zeros((L, D), jnp.float32),
        "fnorm_w": jnp.ones((D,), jnp.float32),
        "fnorm_b": jnp.zeros((D,), jnp.float32),
        "k1_w": u(ks[8], (D, D)),
        "k1_b": u(ks[9], (D,)),
        "k2_w": u(ks[10], (1, D)),
        "k2_b": u(ks[11], (1,)),
    }


def pack_params(p):
    """One-time host-side repack: scale-fold + pre-transpose + concatenate."""
    L, D = N_LAYERS, D_MODEL
    scale = 1.0 / math.sqrt(HEAD_DIM)

    # Fold the 1/sqrt(head_dim) softmax scale into Wq and the q bias (free).
    in_proj_w = p["in_proj_w"].at[:, 0:D, :].multiply(scale)
    in_proj_b = p["in_proj_b"].at[:, 0:D].multiply(scale)

    # (L, D, 6D) bf16: [Wqkv^T | Wo^T | W1^T | W2^T]
    layer_w = jnp.concatenate(
        [
            jnp.transpose(in_proj_w, (0, 2, 1)),         # (L, D, 3D)
            jnp.transpose(p["out_proj_w"], (0, 2, 1)),   # (L, D, D)
            jnp.transpose(p["lin1_w"], (0, 2, 1)),       # (L, D, D)
            jnp.transpose(p["lin2_w"], (0, 2, 1)),       # (L, D, D)
        ],
        axis=-1,
    ).astype(jnp.bfloat16)

    # (L, 10, D) f32: q/k/v bias, out_proj bias, lin1/lin2 bias, norm1/norm2 w/b
    layer_v = jnp.stack(
        [
            in_proj_b[:, 0 * D:1 * D],
            in_proj_b[:, 1 * D:2 * D],
            in_proj_b[:, 2 * D:3 * D],
            p["out_proj_b"],
            p["lin1_b"],
            p["lin2_b"],
            p["norm1_w"],
            p["norm1_b"],
            p["norm2_w"],
            p["norm2_b"],
        ],
        axis=1,
    )

    # (8, D) f32: fnorm_w, fnorm_b, k1_b, k2_w row, k2_b scalar (at [4, 0])
    head_v = jnp.zeros((8, D), jnp.float32)
    head_v = head_v.at[_FNW].set(p["fnorm_w"])
    head_v = head_v.at[_FNB].set(p["fnorm_b"])
    head_v = head_v.at[_K1B].set(p["k1_b"])
    head_v = head_v.at[_K2W].set(p["k2_w"][0])
    head_v = head_v.at[_K2B, 0].set(p["k2_b"][0])

    k1_w = jnp.transpose(p["k1_w"]).astype(jnp.bfloat16)  # (D, D)

    return {"layer_w": layer_w, "layer_v": layer_v, "k1_w": k1_w,
            "head_v": head_v}


if __name__ == "__main__":
    key = jax.random.PRNGKey(0)
    k_x, k_p = jax.random.split(key)
    x = jax.random.normal(k_x, (SEQ, BATCH, D_MODEL), jnp.float32)
    packed = pack_params(init_params(k_p))

    fwd = jax.jit(functools.partial(transformer_forward, packed=packed))
    y = jax.block_until_ready(fwd(x))

    assert y.shape == (SEQ, BATCH, 1), y.shape
    assert bool(jnp.all(jnp.isfinite(y)))
    assert bool(jnp.all((y > 0.0) & (y < 1.0)))  # sigmoid range
    print("KERNEL_OK")
</pallas_src>

<mosaic_0001>
module attributes {stable_mosaic.version = 11 : i64} {
  func.func @transformer_kernel(%arg0: i32, %arg1: memref<16x128xf32, #tpu.memory_space<vmem>>, %arg2: memref<2x128x768xbf16, #tpu.memory_space<vmem>>, %arg3: memref<2x10x128xf32, #tpu.memory_space<vmem>>, %arg4: memref<128x128xbf16, #tpu.memory_space<vmem>>, %arg5: memref<8x128xf32, #tpu.memory_space<vmem>>, %arg6: memref<16x1xf32, #tpu.memory_space<vmem>>) attributes {dimension_semantics = [#tpu.dimension_semantics<parallel>], iteration_bounds = array<i64: 1>, scalar_prefetch = 0 : i64, scratch_operands = 0 : i64, tpu.core_type = #tpu.core_type<tc>, window_params = [{transform_indices = @transform_0, window_bounds = array<i64: 16, 128>}, {pipeline_mode = #tpu.pipeline_mode<synchronous>, transform_indices = @transform_1, window_bounds = array<i64: 2, 128, 768>}, {pipeline_mode = #tpu.pipeline_mode<synchronous>, transform_indices = @transform_2, window_bounds = array<i64: 2, 10, 128>}, {pipeline_mode = #tpu.pipeline_mode<synchronous>, transform_indices = @transform_3, window_bounds = array<i64: 128, 128>}, {pipeline_mode = #tpu.pipeline_mode<synchronous>, transform_indices = @transform_4, window_bounds = array<i64: 8, 128>}, {transform_indices = @transform_5, window_bounds = array<i64: 16, 1>}]} {
    %c0 = arith.constant 0 : index
    %c0_0 = arith.constant 0 : index
    %0 = vector.load %arg1[%c0, %c0_0] : memref<16x128xf32, #tpu.memory_space<vmem>>, vector<16x128xf32>
    %c0_1 = arith.constant 0 : index
    %c0_2 = arith.constant 0 : index
    %c0_3 = arith.constant 0 : index
    %1 = vector.load %arg3[%c0_1, %c0_2, %c0_3] : memref<2x10x128xf32, #tpu.memory_space<vmem>>, vector<1x10x128xf32>
    %2 = vector.shape_cast %1 : vector<1x10x128xf32> to vector<10x128xf32>
    %c0_4 = arith.constant 0 : index
    %c0_5 = arith.constant 0 : index
    %c0_6 = arith.constant 0 : index
    %3 = vector.load %arg2[%c0_4, %c0_5, %c0_6] : memref<2x128x768xbf16, #tpu.memory_space<vmem>>, vector<1x128x384xbf16>
    %4 = vector.shape_cast %3 : vector<1x128x384xbf16> to vector<128x384xbf16>
    %5 = arith.truncf %0 : vector<16x128xf32> to vector<16x128xbf16>
    %cst = arith.constant dense<0.000000e+00> : vector<16x384xf32>
    %6 = tpu.matmul %5, %4, %cst {dimension_numbers = #tpu.dot_dimension_numbers<[1], [0], [0], [1], [0, 0, 1, 1], [], []>} : vector<16x128xbf16>, vector<128x384xbf16>, vector<16x384xf32> -> vector<16x384xf32>
    %7 = vector.extract_strided_slice %6 {offsets = [0, 0], sizes = [16, 128], strides = [1, 1]} : vector<16x384xf32> to vector<16x128xf32>
    %8 = vector.extract_strided_slice %2 {offsets = [0, 0], sizes = [1, 128], strides = [1, 1]} : vector<10x128xf32> to vector<1x128xf32>
    %9 = vector.broadcast %8 : vector<1x128xf32> to vector<16x128xf32>
    %10 = arith.addf %7, %9 : vector<16x128xf32>
    %11 = vector.shape_cast %10 : vector<16x128xf32> to vector<2x8x128xf32>
    %12 = vector.extract_strided_slice %6 {offsets = [0, 128], sizes = [16, 128], strides = [1, 1]} : vector<16x384xf32> to vector<16x128xf32>
    %13 = vector.extract_strided_slice %2 {offsets = [1, 0], sizes = [1, 128], strides = [1, 1]} : vector<10x128xf32> to vector<1x128xf32>
    %14 = vector.broadcast %13 : vector<1x128xf32> to vector<16x128xf32>
    %15 = arith.addf %12, %14 : vector<16x128xf32>
    %16 = vector.shape_cast %15 : vector<16x128xf32> to vector<2x8x128xf32>
    %17 = vector.extract_strided_slice %6 {offsets = [0, 256], sizes = [16, 128], strides = [1, 1]} : vector<16x384xf32> to vector<16x128xf32>
    %18 = vector.extract_strided_slice %2 {offsets = [2, 0], sizes = [1, 128], strides = [1, 1]} : vector<10x128xf32> to vector<1x128xf32>
    %19 = vector.broadcast %18 : vector<1x128xf32> to vector<16x128xf32>
    %20 = arith.addf %17, %19 : vector<16x128xf32>
    %21 = vector.shape_cast %20 : vector<16x128xf32> to vector<2x8x128xf32>
    %22 = vector.extract_strided_slice %11 {offsets = [0, 0, 0], sizes = [2, 8, 32], strides = [1, 1, 1]} : vector<2x8x128xf32> to vector<2x8x32xf32>
    %23 = vector.extract_strided_slice %11 {offsets = [0, 0, 32], sizes = [2, 8, 32], strides = [1, 1, 1]} : vector<2x8x128xf32> to vector<2x8x32xf32>
    %24 = vector.extract_strided_slice %11 {offsets = [0, 0, 64], sizes = [2, 8, 32], strides = [1, 1, 1]} : vector<2x8x128xf32> to vector<2x8x32xf32>
    %25 = vector.extract_strided_slice %11 {offsets = [0, 0, 96], sizes = [2, 8, 32], strides = [1, 1, 1]} : vector<2x8x128xf32> to vector<2x8x32xf32>
    %26 = tpu.concatenate %22, %23, %24, %25 in 0 : vector<2x8x32xf32>, vector<2x8x32xf32>, vector<2x8x32xf32>, vector<2x8x32xf32> -> vector<8x8x32xf32>
    %27 = arith.truncf %26 : vector<8x8x32xf32> to vector<8x8x32xbf16>
    %28 = vector.extract_strided_slice %16 {offsets = [0, 0, 0], sizes = [2, 8, 32], strides = [1, 1, 1]} : vector<2x8x128xf32> to vector<2x8x32xf32>
    %29 = vector.extract_strided_slice %16 {offsets = [0, 0, 32], sizes = [2, 8, 32], strides = [1, 1, 1]} : vector<2x8x128xf32> to vector<2x8x32xf32>
    %30 = vector.extract_strided_slice %16 {offsets = [0, 0, 64], sizes = [2, 8, 32], strides = [1, 1, 1]} : vector<2x8x128xf32> to vector<2x8x32xf32>
    %31 = vector.extract_strided_slice %16 {offsets = [0, 0, 96], sizes = [2, 8, 32], strides = [1, 1, 1]} : vector<2x8x128xf32> to vector<2x8x32xf32>
    %32 = tpu.concatenate %28, %29, %30, %31 in 0 : vector<2x8x32xf32>, vector<2x8x32xf32>, vector<2x8x32xf32>, vector<2x8x32xf32> -> vector<8x8x32xf32>
    %33 = arith.truncf %32 : vector<8x8x32xf32> to vector<8x8x32xbf16>
    %34 = vector.extract_strided_slice %21 {offsets = [0, 0, 0], sizes = [2, 8, 32], strides = [1, 1, 1]} : vector<2x8x128xf32> to vector<2x8x32xf32>
    %35 = vector.extract_strided_slice %21 {offsets = [0, 0, 32], sizes = [2, 8, 32], strides = [1, 1, 1]} : vector<2x8x128xf32> to vector<2x8x32xf32>
    %36 = vector.extract_strided_slice %21 {offsets = [0, 0, 64], sizes = [2, 8, 32], strides = [1, 1, 1]} : vector<2x8x128xf32> to vector<2x8x32xf32>
    %37 = vector.extract_strided_slice %21 {offsets = [0, 0, 96], sizes = [2, 8, 32], strides = [1, 1, 1]} : vector<2x8x128xf32> to vector<2x8x32xf32>
    %38 = tpu.concatenate %34, %35, %36, %37 in 0 : vector<2x8x32xf32>, vector<2x8x32xf32>, vector<2x8x32xf32>, vector<2x8x32xf32> -> vector<8x8x32xf32>
    %39 = arith.truncf %38 : vector<8x8x32xf32> to vector<8x8x32xbf16>
    "tpu.trace_start"() <{level = 10 : i32, message = "bqd,bkd->bqk"}> : () -> ()
    %cst_7 = arith.constant dense<0.000000e+00> : vector<8x8x8xf32>
    %40 = tpu.matmul %27, %33, %cst_7 {dimension_numbers = #tpu.dot_dimension_numbers<[2], [2], [1], [1], [0, 0, 0, 1, 1, 1], [0], [0]>} : vector<8x8x32xbf16>, vector<8x8x32xbf16>, vector<8x8x8xf32> -> vector<8x8x8xf32>
    "tpu.trace_stop"() : () -> ()
    %cst_8 = arith.constant dense<0xFF800000> : vector<8x8xf32>
    %41 = vector.multi_reduction <maximumf>, %40, %cst_8 [2] : vector<8x8x8xf32> to vector<8x8xf32>
    %42 = vector.shape_cast %41 : vector<8x8xf32> to vector<8x8x1xf32>
    %43 = vector.broadcast %42 : vector<8x8x1xf32> to vector<8x8x8xf32>
    %44 = arith.subf %40, %43 : vector<8x8x8xf32>
    %45 = math.exp %44 : vector<8x8x8xf32>
    %cst_9 = arith.constant dense<0.000000e+00> : vector<8x8xf32>
    %46 = vector.multi_reduction <add>, %45, %cst_9 [2] : vector<8x8x8xf32> to vector<8x8xf32>
    %47 = vector.shape_cast %46 : vector<8x8xf32> to vector<8x8x1xf32>
    %48 = tpu.reciprocal %47 {approx = true} : vector<8x8x1xf32> -> vector<8x8x1xf32>
    %49 = vector.broadcast %48 : vector<8x8x1xf32> to vector<8x8x8xf32>
    %50 = arith.mulf %45, %49 : vector<8x8x8xf32>
    %51 = arith.truncf %50 : vector<8x8x8xf32> to vector<8x8x8xbf16>
    "tpu.trace_start"() <{level = 10 : i32, message = "bqk,bkd->bqd"}> : () -> ()
    %cst_10 = arith.constant dense<0.000000e+00> : vector<8x8x32xf32>
    %52 = tpu.matmul %51, %39, %cst_10 {dimension_numbers = #tpu.dot_dimension_numbers<[2], [1], [1], [2], [0, 0, 0, 1, 1, 2], [0], [0]>} : vector<8x8x8xbf16>, vector<8x8x32xbf16>, vector<8x8x32xf32> -> vector<8x8x32xf32>
    "tpu.trace_stop"() : () -> ()
    %53 = vector.extract_strided_slice %52 {offsets = [0, 0, 0], sizes = [2, 8, 32], strides = [1, 1, 1]} : vector<8x8x32xf32> to vector<2x8x32xf32>
    %54 = vector.extract_strided_slice %52 {offsets = [2, 0, 0], sizes = [2, 8, 32], strides = [1, 1, 1]} : vector<8x8x32xf32> to vector<2x8x32xf32>
    %55 = vector.extract_strided_slice %52 {offsets = [4, 0, 0], sizes = [2, 8, 32], strides = [1, 1, 1]} : vector<8x8x32xf32> to vector<2x8x32xf32>
    %56 = vector.extract_strided_slice %52 {offsets = [6, 0, 0], sizes = [2, 8, 32], strides = [1, 1, 1]} : vector<8x8x32xf32> to vector<2x8x32xf32>
    %57 = tpu.concatenate %53, %54, %55, %56 in 2 : vector<2x8x32xf32>, vector<2x8x32xf32>, vector<2x8x32xf32>, vector<2x8x32xf32> -> vector<2x8x128xf32>
    %58 = vector.shape_cast %57 : vector<2x8x128xf32> to vector<16x128xf32>
    %c0_11 = arith.constant 0 : index
    %c0_12 = arith.constant 0 : index
    %c384 = arith.constant 384 : index
    %59 = vector.load %arg2[%c0_11, %c0_12, %c384] : memref<2x128x768xbf16, #tpu.memory_space<vmem>>, vector<1x128x128xbf16>
    %60 = vector.shape_cast %59 : vector<1x128x128xbf16> to vector<128x128xbf16>
    %61 = arith.truncf %58 : vector<16x128xf32> to vector<16x128xbf16>
    %cst_13 = arith.constant dense<0.000000e+00> : vector<16x128xf32>
    %62 = tpu.matmul %61, %60, %cst_13 {dimension_numbers = #tpu.dot_dimension_numbers<[1], [0], [0], [1], [0, 0, 1, 1], [], []>} : vector<16x128xbf16>, vector<128x128xbf16>, vector<16x128xf32> -> vector<16x128xf32>
    %63 = vector.extract_strided_slice %2 {offsets = [3, 0], sizes = [1, 128], strides = [1, 1]} : vector<10x128xf32> to vector<1x128xf32>
    %64 = vector.broadcast %63 : vector<1x128xf32> to vector<16x128xf32>
    %65 = arith.addf %62, %64 : vector<16x128xf32>
    %66 = arith.addf %0, %65 : vector<16x128xf32>
    %67 = vector.extract_strided_slice %2 {offsets = [6, 0], sizes = [1, 128], strides = [1, 1]} : vector<10x128xf32> to vector<1x128xf32>
    %68 = vector.extract_strided_slice %2 {offsets = [7, 0], sizes = [1, 128], strides = [1, 1]} : vector<10x128xf32> to vector<1x128xf32>
    %cst_14 = arith.constant dense<0.000000e+00> : vector<16xf32>
    %69 = vector.multi_reduction <add>, %66, %cst_14 [1] : vector<16x128xf32> to vector<16xf32>
    %70 = vector.shape_cast %69 : vector<16xf32> to vector<16x1xf32>
    %cst_15 = arith.constant 1.280000e+02 : f32
    %71 = vector.broadcast %cst_15 : f32 to vector<16x1xf32>
    %72 = arith.divf %70, %71 : vector<16x1xf32>
    %73 = vector.broadcast %72 : vector<16x1xf32> to vector<16x128xf32>
    %74 = arith.subf %66, %73 : vector<16x128xf32>
    %75 = arith.mulf %74, %74 : vector<16x128xf32>
    %cst_16 = arith.constant dense<0.000000e+00> : vector<16xf32>
    %76 = vector.multi_reduction <add>, %75, %cst_16 [1] : vector<16x128xf32> to vector<16xf32>
    %77 = vector.shape_cast %76 : vector<16xf32> to vector<16x1xf32>
    %cst_17 = arith.constant 1.280000e+02 : f32
    %78 = vector.broadcast %cst_17 : f32 to vector<16x1xf32>
    %79 = arith.divf %77, %78 : vector<16x1xf32>
    %80 = vector.broadcast %72 : vector<16x1xf32> to vector<16x128xf32>
    %81 = arith.subf %66, %80 : vector<16x128xf32>
    %cst_18 = arith.constant 9.99999974E-6 : f32
    %82 = vector.broadcast %cst_18 : f32 to vector<16x1xf32>
    %83 = arith.addf %79, %82 : vector<16x1xf32>
    %84 = math.rsqrt %83 : vector<16x1xf32>
    %85 = vector.broadcast %84 : vector<16x1xf32> to vector<16x128xf32>
    %86 = arith.mulf %81, %85 : vector<16x128xf32>
    %87 = vector.broadcast %67 : vector<1x128xf32> to vector<16x128xf32>
    %88 = arith.mulf %86, %87 : vector<16x128xf32>
    %89 = vector.broadcast %68 : vector<1x128xf32> to vector<16x128xf32>
    %90 = arith.addf %88, %89 : vector<16x128xf32>
    %c0_19 = arith.constant 0 : index
    %c0_20 = arith.constant 0 : index
    %c512 = arith.constant 512 : index
    %91 = vector.load %arg2[%c0_19, %c0_20, %c512] : memref<2x128x768xbf16, #tpu.memory_space<vmem>>, vector<1x128x128xbf16>
    %92 = vector.shape_cast %91 : vector<1x128x128xbf16> to vector<128x128xbf16>
    %c0_21 = arith.constant 0 : index
    %c0_22 = arith.constant 0 : index
    %c640 = arith.constant 640 : index
    %93 = vector.load %arg2[%c0_21, %c0_22, %c640] : memref<2x128x768xbf16, #tpu.memory_space<vmem>>, vector<1x128x128xbf16>
    %94 = vector.shape_cast %93 : vector<1x128x128xbf16> to vector<128x128xbf16>
    %95 = arith.truncf %90 : vector<16x128xf32> to vector<16x128xbf16>
    %cst_23 = arith.constant dense<0.000000e+00> : vector<16x128xf32>
    %96 = tpu.matmul %95, %92, %cst_23 {dimension_numbers = #tpu.dot_dimension_numbers<[1], [0], [0], [1], [0, 0, 1, 1], [], []>} : vector<16x128xbf16>, vector<128x128xbf16>, vector<16x128xf32> -> vector<16x128xf32>
    %97 = vector.extract_strided_slice %2 {offsets = [4, 0], sizes = [1, 128], strides = [1, 1]} : vector<10x128xf32> to vector<1x128xf32>
    %98 = vector.broadcast %97 : vector<1x128xf32> to vector<16x128xf32>
    %99 = arith.addf %96, %98 : vector<16x128xf32>
    %cst_24 = arith.constant 0.000000e+00 : f32
    %100 = vector.broadcast %cst_24 : f32 to vector<16x128xf32>
    %101 = arith.maximumf %99, %100 : vector<16x128xf32>
    %102 = arith.truncf %101 : vector<16x128xf32> to vector<16x128xbf16>
    %cst_25 = arith.constant dense<0.000000e+00> : vector<16x128xf32>
    %103 = tpu.matmul %102, %94, %cst_25 {dimension_numbers = #tpu.dot_dimension_numbers<[1], [0], [0], [1], [0, 0, 1, 1], [], []>} : vector<16x128xbf16>, vector<128x128xbf16>, vector<16x128xf32> -> vector<16x128xf32>
    %104 = vector.extract_strided_slice %2 {offsets = [5, 0], sizes = [1, 128], strides = [1, 1]} : vector<10x128xf32> to vector<1x128xf32>
    %105 = vector.broadcast %104 : vector<1x128xf32> to vector<16x128xf32>
    %106 = arith.addf %103, %105 : vector<16x128xf32>
    %107 = arith.addf %90, %106 : vector<16x128xf32>
    %108 = vector.extract_strided_slice %2 {offsets = [8, 0], sizes = [1, 128], strides = [1, 1]} : vector<10x128xf32> to vector<1x128xf32>
    %109 = vector.extract_strided_slice %2 {offsets = [9, 0], sizes = [1, 128], strides = [1, 1]} : vector<10x128xf32> to vector<1x128xf32>
    %cst_26 = arith.constant dense<0.000000e+00> : vector<16xf32>
    %110 = vector.multi_reduction <add>, %107, %cst_26 [1] : vector<16x128xf32> to vector<16xf32>
    %111 = vector.shape_cast %110 : vector<16xf32> to vector<16x1xf32>
    %cst_27 = arith.constant 1.280000e+02 : f32
    %112 = vector.broadcast %cst_27 : f32 to vector<16x1xf32>
    %113 = arith.divf %111, %112 : vector<16x1xf32>
    %114 = vector.broadcast %113 : vector<16x1xf32> to vector<16x128xf32>
    %115 = arith.subf %107, %114 : vector<16x128xf32>
    %116 = arith.mulf %115, %115 : vector<16x128xf32>
    %cst_28 = arith.constant dense<0.000000e+00> : vector<16xf32>
    %117 = vector.multi_reduction <add>, %116, %cst_28 [1] : vector<16x128xf32> to vector<16xf32>
    %118 = vector.shape_cast %117 : vector<16xf32> to vector<16x1xf32>
    %cst_29 = arith.constant 1.280000e+02 : f32
    %119 = vector.broadcast %cst_29 : f32 to vector<16x1xf32>
    %120 = arith.divf %118, %119 : vector<16x1xf32>
    %121 = vector.broadcast %113 : vector<16x1xf32> to vector<16x128xf32>
    %122 = arith.subf %107, %121 : vector<16x128xf32>
    %cst_30 = arith.constant 9.99999974E-6 : f32
    %123 = vector.broadcast %cst_30 : f32 to vector<16x1xf32>
    %124 = arith.addf %120, %123 : vector<16x1xf32>
    %125 = math.rsqrt %124 : vector<16x1xf32>
    %126 = vector.broadcast %125 : vector<16x1xf32> to vector<16x128xf32>
    %127 = arith.mulf %122, %126 : vector<16x128xf32>
    %128 = vector.broadcast %108 : vector<1x128xf32> to vector<16x128xf32>
    %129 = arith.mulf %127, %128 : vector<16x128xf32>
    %130 = vector.broadcast %109 : vector<1x128xf32> to vector<16x128xf32>
    %131 = arith.addf %129, %130 : vector<16x128xf32>
    %c1 = arith.constant 1 : index
    %c0_31 = arith.constant 0 : index
    %c0_32 = arith.constant 0 : index
    %132 = vector.load %arg3[%c1, %c0_31, %c0_32] : memref<2x10x128xf32, #tpu.memory_space<vmem>>, vector<1x10x128xf32>
    %133 = vector.shape_cast %132 : vector<1x10x128xf32> to vector<10x128xf32>
    %c1_33 = arith.constant 1 : index
    %c0_34 = arith.constant 0 : index
    %c0_35 = arith.constant 0 : index
    %134 = vector.load %arg2[%c1_33, %c0_34, %c0_35] : memref<2x128x768xbf16, #tpu.memory_space<vmem>>, vector<1x128x384xbf16>
    %135 = vector.shape_cast %134 : vector<1x128x384xbf16> to vector<128x384xbf16>
    %136 = arith.truncf %131 : vector<16x128xf32> to vector<16x128xbf16>
    %cst_36 = arith.constant dense<0.000000e+00> : vector<16x384xf32>
    %137 = tpu.matmul %136, %135, %cst_36 {dimension_numbers = #tpu.dot_dimension_numbers<[1], [0], [0], [1], [0, 0, 1, 1], [], []>} : vector<16x128xbf16>, vector<128x384xbf16>, vector<16x384xf32> -> vector<16x384xf32>
    %138 = vector.extract_strided_slice %137 {offsets = [0, 0], sizes = [16, 128], strides = [1, 1]} : vector<16x384xf32> to vector<16x128xf32>
    %139 = vector.extract_strided_slice %133 {offsets = [0, 0], sizes = [1, 128], strides = [1, 1]} : vector<10x128xf32> to vector<1x128xf32>
    %140 = vector.broadcast %139 : vector<1x128xf32> to vector<16x128xf32>
    %141 = arith.addf %138, %140 : vector<16x128xf32>
    %142 = vector.shape_cast %141 : vector<16x128xf32> to vector<2x8x128xf32>
    %143 = vector.extract_strided_slice %137 {offsets = [0, 128], sizes = [16, 128], strides = [1, 1]} : vector<16x384xf32> to vector<16x128xf32>
    %144 = vector.extract_strided_slice %133 {offsets = [1, 0], sizes = [1, 128], strides = [1, 1]} : vector<10x128xf32> to vector<1x128xf32>
    %145 = vector.broadcast %144 : vector<1x128xf32> to vector<16x128xf32>
    %146 = arith.addf %143, %145 : vector<16x128xf32>
    %147 = vector.shape_cast %146 : vector<16x128xf32> to vector<2x8x128xf32>
    %148 = vector.extract_strided_slice %137 {offsets = [0, 256], sizes = [16, 128], strides = [1, 1]} : vector<16x384xf32> to vector<16x128xf32>
    %149 = vector.extract_strided_slice %133 {offsets = [2, 0], sizes = [1, 128], strides = [1, 1]} : vector<10x128xf32> to vector<1x128xf32>
    %150 = vector.broadcast %149 : vector<1x128xf32> to vector<16x128xf32>
    %151 = arith.addf %148, %150 : vector<16x128xf32>
    %152 = vector.shape_cast %151 : vector<16x128xf32> to vector<2x8x128xf32>
    %153 = vector.extract_strided_slice %142 {offsets = [0, 0, 0], sizes = [2, 8, 32], strides = [1, 1, 1]} : vector<2x8x128xf32> to vector<2x8x32xf32>
    %154 = vector.extract_strided_slice %142 {offsets = [0, 0, 32], sizes = [2, 8, 32], strides = [1, 1, 1]} : vector<2x8x128xf32> to vector<2x8x32xf32>
    %155 = vector.extract_strided_slice %142 {offsets = [0, 0, 64], sizes = [2, 8, 32], strides = [1, 1, 1]} : vector<2x8x128xf32> to vector<2x8x32xf32>
    %156 = vector.extract_strided_slice %142 {offsets = [0, 0, 96], sizes = [2, 8, 32], strides = [1, 1, 1]} : vector<2x8x128xf32> to vector<2x8x32xf32>
    %157 = tpu.concatenate %153, %154, %155, %156 in 0 : vector<2x8x32xf32>, vector<2x8x32xf32>, vector<2x8x32xf32>, vector<2x8x32xf32> -> vector<8x8x32xf32>
    %158 = arith.truncf %157 : vector<8x8x32xf32> to vector<8x8x32xbf16>
    %159 = vector.extract_strided_slice %147 {offsets = [0, 0, 0], sizes = [2, 8, 32], strides = [1, 1, 1]} : vector<2x8x128xf32> to vector<2x8x32xf32>
    %160 = vector.extract_strided_slice %147 {offsets = [0, 0, 32], sizes = [2, 8, 32], strides = [1, 1, 1]} : vector<2x8x128xf32> to vector<2x8x32xf32>
    %161 = vector.extract_strided_slice %147 {offsets = [0, 0, 64], sizes = [2, 8, 32], strides = [1, 1, 1]} : vector<2x8x128xf32> to vector<2x8x32xf32>
    %162 = vector.extract_strided_slice %147 {offsets = [0, 0, 96], sizes = [2, 8, 32], strides = [1, 1, 1]} : vector<2x8x128xf32> to vector<2x8x32xf32>
    %163 = tpu.concatenate %159, %160, %161, %162 in 0 : vector<2x8x32xf32>, vector<2x8x32xf32>, vector<2x8x32xf32>, vector<2x8x32xf32> -> vector<8x8x32xf32>
    %164 = arith.truncf %163 : vector<8x8x32xf32> to vector<8x8x32xbf16>
    %165 = vector.extract_strided_slice %152 {offsets = [0, 0, 0], sizes = [2, 8, 32], strides = [1, 1, 1]} : vector<2x8x128xf32> to vector<2x8x32xf32>
    %166 = vector.extract_strided_slice %152 {offsets = [0, 0, 32], sizes = [2, 8, 32], strides = [1, 1, 1]} : vector<2x8x128xf32> to vector<2x8x32xf32>
    %167 = vector.extract_strided_slice %152 {offsets = [0, 0, 64], sizes = [2, 8, 32], strides = [1, 1, 1]} : vector<2x8x128xf32> to vector<2x8x32xf32>
    %168 = vector.extract_strided_slice %152 {offsets = [0, 0, 96], sizes = [2, 8, 32], strides = [1, 1, 1]} : vector<2x8x128xf32> to vector<2x8x32xf32>
    %169 = tpu.concatenate %165, %166, %167, %168 in 0 : vector<2x8x32xf32>, vector<2x8x32xf32>, vector<2x8x32xf32>, vector<2x8x32xf32> -> vector<8x8x32xf32>
    %170 = arith.truncf %169 : vector<8x8x32xf32> to vector<8x8x32xbf16>
    "tpu.trace_start"() <{level = 10 : i32, message = "bqd,bkd->bqk"}> : () -> ()
    %cst_37 = arith.constant dense<0.000000e+00> : vector<8x8x8xf32>
    %171 = tpu.matmul %158, %164, %cst_37 {dimension_numbers = #tpu.dot_dimension_numbers<[2], [2], [1], [1], [0, 0, 0, 1, 1, 1], [0], [0]>} : vector<8x8x32xbf16>, vector<8x8x32xbf16>, vector<8x8x8xf32> -> vector<8x8x8xf32>
    "tpu.trace_stop"() : () -> ()
    %cst_38 = arith.constant dense<0xFF800000> : vector<8x8xf32>
    %172 = vector.multi_reduction <maximumf>, %171, %cst_38 [2] : vector<8x8x8xf32> to vector<8x8xf32>
    %173 = vector.shape_cast %172 : vector<8x8xf32> to vector<8x8x1xf32>
    %174 = vector.broadcast %173 : vector<8x8x1xf32> to vector<8x8x8xf32>
    %175 = arith.subf %171, %174 : vector<8x8x8xf32>
    %176 = math.exp %175 : vector<8x8x8xf32>
    %cst_39 = arith.constant dense<0.000000e+00> : vector<8x8xf32>
    %177 = vector.multi_reduction <add>, %176, %cst_39 [2] : vector<8x8x8xf32> to vector<8x8xf32>
    %178 = vector.shape_cast %177 : vector<8x8xf32> to vector<8x8x1xf32>
    %179 = tpu.reciprocal %178 {approx = true} : vector<8x8x1xf32> -> vector<8x8x1xf32>
    %180 = vector.broadcast %179 : vector<8x8x1xf32> to vector<8x8x8xf32>
    %181 = arith.mulf %176, %180 : vector<8x8x8xf32>
    %182 = arith.truncf %181 : vector<8x8x8xf32> to vector<8x8x8xbf16>
    "tpu.trace_start"() <{level = 10 : i32, message = "bqk,bkd->bqd"}> : () -> ()
    %cst_40 = arith.constant dense<0.000000e+00> : vector<8x8x32xf32>
    %183 = tpu.matmul %182, %170, %cst_40 {dimension_numbers = #tpu.dot_dimension_numbers<[2], [1], [1], [2], [0, 0, 0, 1, 1, 2], [0], [0]>} : vector<8x8x8xbf16>, vector<8x8x32xbf16>, vector<8x8x32xf32> -> vector<8x8x32xf32>
    "tpu.trace_stop"() : () -> ()
    %184 = vector.extract_strided_slice %183 {offsets = [0, 0, 0], sizes = [2, 8, 32], strides = [1, 1, 1]} : vector<8x8x32xf32> to vector<2x8x32xf32>
    %185 = vector.extract_strided_slice %183 {offsets = [2, 0, 0], sizes = [2, 8, 32], strides = [1, 1, 1]} : vector<8x8x32xf32> to vector<2x8x32xf32>
    %186 = vector.extract_strided_slice %183 {offsets = [4, 0, 0], sizes = [2, 8, 32], strides = [1, 1, 1]} : vector<8x8x32xf32> to vector<2x8x32xf32>
    %187 = vector.extract_strided_slice %183 {offsets = [6, 0, 0], sizes = [2, 8, 32], strides = [1, 1, 1]} : vector<8x8x32xf32> to vector<2x8x32xf32>
    %188 = tpu.concatenate %184, %185, %186, %187 in 2 : vector<2x8x32xf32>, vector<2x8x32xf32>, vector<2x8x32xf32>, vector<2x8x32xf32> -> vector<2x8x128xf32>
    %189 = vector.shape_cast %188 : vector<2x8x128xf32> to vector<16x128xf32>
    %c1_41 = arith.constant 1 : index
    %c0_42 = arith.constant 0 : index
    %c384_43 = arith.constant 384 : index
    %190 = vector.load %arg2[%c1_41, %c0_42, %c384_43] : memref<2x128x768xbf16, #tpu.memory_space<vmem>>, vector<1x128x128xbf16>
    %191 = vector.shape_cast %190 : vector<1x128x128xbf16> to vector<128x128xbf16>
    %192 = arith.truncf %189 : vector<16x128xf32> to vector<16x128xbf16>
    %cst_44 = arith.constant dense<0.000000e+00> : vector<16x128xf32>
    %193 = tpu.matmul %192, %191, %cst_44 {dimension_numbers = #tpu.dot_dimension_numbers<[1], [0], [0], [1], [0, 0, 1, 1], [], []>} : vector<16x128xbf16>, vector<128x128xbf16>, vector<16x128xf32> -> vector<16x128xf32>
    %194 = vector.extract_strided_slice %133 {offsets = [3, 0], sizes = [1, 128], strides = [1, 1]} : vector<10x128xf32> to vector<1x128xf32>
    %195 = vector.broadcast %194 : vector<1x128xf32> to vector<16x128xf32>
    %196 = arith.addf %193, %195 : vector<16x128xf32>
    %197 = arith.addf %131, %196 : vector<16x128xf32>
    %198 = vector.extract_strided_slice %133 {offsets = [6, 0], sizes = [1, 128], strides = [1, 1]} : vector<10x128xf32> to vector<1x128xf32>
    %199 = vector.extract_strided_slice %133 {offsets = [7, 0], sizes = [1, 128], strides = [1, 1]} : vector<10x128xf32> to vector<1x128xf32>
    %cst_45 = arith.constant dense<0.000000e+00> : vector<16xf32>
    %200 = vector.multi_reduction <add>, %197, %cst_45 [1] : vector<16x128xf32> to vector<16xf32>
    %201 = vector.shape_cast %200 : vector<16xf32> to vector<16x1xf32>
    %cst_46 = arith.constant 1.280000e+02 : f32
    %202 = vector.broadcast %cst_46 : f32 to vector<16x1xf32>
    %203 = arith.divf %201, %202 : vector<16x1xf32>
    %204 = vector.broadcast %203 : vector<16x1xf32> to vector<16x128xf32>
    %205 = arith.subf %197, %204 : vector<16x128xf32>
    %206 = arith.mulf %205, %205 : vector<16x128xf32>
    %cst_47 = arith.constant dense<0.000000e+00> : vector<16xf32>
    %207 = vector.multi_reduction <add>, %206, %cst_47 [1] : vector<16x128xf32> to vector<16xf32>
    %208 = vector.shape_cast %207 : vector<16xf32> to vector<16x1xf32>
    %cst_48 = arith.constant 1.280000e+02 : f32
    %209 = vector.broadcast %cst_48 : f32 to vector<16x1xf32>
    %210 = arith.divf %208, %209 : vector<16x1xf32>
    %211 = vector.broadcast %203 : vector<16x1xf32> to vector<16x128xf32>
    %212 = arith.subf %197, %211 : vector<16x128xf32>
    %cst_49 = arith.constant 9.99999974E-6 : f32
    %213 = vector.broadcast %cst_49 : f32 to vector<16x1xf32>
    %214 = arith.addf %210, %213 : vector<16x1xf32>
    %215 = math.rsqrt %214 : vector<16x1xf32>
    %216 = vector.broadcast %215 : vector<16x1xf32> to vector<16x128xf32>
    %217 = arith.mulf %212, %216 : vector<16x128xf32>
    %218 = vector.broadcast %198 : vector<1x128xf32> to vector<16x128xf32>
    %219 = arith.mulf %217, %218 : vector<16x128xf32>
    %220 = vector.broadcast %199 : vector<1x128xf32> to vector<16x128xf32>
    %221 = arith.addf %219, %220 : vector<16x128xf32>
    %c1_50 = arith.constant 1 : index
    %c0_51 = arith.constant 0 : index
    %c512_52 = arith.constant 512 : index
    %222 = vector.load %arg2[%c1_50, %c0_51, %c512_52] : memref<2x128x768xbf16, #tpu.memory_space<vmem>>, vector<1x128x128xbf16>
    %223 = vector.shape_cast %222 : vector<1x128x128xbf16> to vector<128x128xbf16>
    %c1_53 = arith.constant 1 : index
    %c0_54 = arith.constant 0 : index
    %c640_55 = arith.constant 640 : index
    %224 = vector.load %arg2[%c1_53, %c0_54, %c640_55] : memref<2x128x768xbf16, #tpu.memory_space<vmem>>, vector<1x128x128xbf16>
    %225 = vector.shape_cast %224 : vector<1x128x128xbf16> to vector<128x128xbf16>
    %226 = arith.truncf %221 : vector<16x128xf32> to vector<16x128xbf16>
    %cst_56 = arith.constant dense<0.000000e+00> : vector<16x128xf32>
    %227 = tpu.matmul %226, %223, %cst_56 {dimension_numbers = #tpu.dot_dimension_numbers<[1], [0], [0], [1], [0, 0, 1, 1], [], []>} : vector<16x128xbf16>, vector<128x128xbf16>, vector<16x128xf32> -> vector<16x128xf32>
    %228 = vector.extract_strided_slice %133 {offsets = [4, 0], sizes = [1, 128], strides = [1, 1]} : vector<10x128xf32> to vector<1x128xf32>
    %229 = vector.broadcast %228 : vector<1x128xf32> to vector<16x128xf32>
    %230 = arith.addf %227, %229 : vector<16x128xf32>
    %cst_57 = arith.constant 0.000000e+00 : f32
    %231 = vector.broadcast %cst_57 : f32 to vector<16x128xf32>
    %232 = arith.maximumf %230, %231 : vector<16x128xf32>
    %233 = arith.truncf %232 : vector<16x128xf32> to vector<16x128xbf16>
    %cst_58 = arith.constant dense<0.000000e+00> : vector<16x128xf32>
    %234 = tpu.matmul %233, %225, %cst_58 {dimension_numbers = #tpu.dot_dimension_numbers<[1], [0], [0], [1], [0, 0, 1, 1], [], []>} : vector<16x128xbf16>, vector<128x128xbf16>, vector<16x128xf32> -> vector<16x128xf32>
    %235 = vector.extract_strided_slice %133 {offsets = [5, 0], sizes = [1, 128], strides = [1, 1]} : vector<10x128xf32> to vector<1x128xf32>
    %236 = vector.broadcast %235 : vector<1x128xf32> to vector<16x128xf32>
    %237 = arith.addf %234, %236 : vector<16x128xf32>
    %238 = arith.addf %221, %237 : vector<16x128xf32>
    %239 = vector.extract_strided_slice %133 {offsets = [8, 0], sizes = [1, 128], strides = [1, 1]} : vector<10x128xf32> to vector<1x128xf32>
    %240 = vector.extract_strided_slice %133 {offsets = [9, 0], sizes = [1, 128], strides = [1, 1]} : vector<10x128xf32> to vector<1x128xf32>
    %cst_59 = arith.constant dense<0.000000e+00> : vector<16xf32>
    %241 = vector.multi_reduction <add>, %238, %cst_59 [1] : vector<16x128xf32> to vector<16xf32>
    %242 = vector.shape_cast %241 : vector<16xf32> to vector<16x1xf32>
    %cst_60 = arith.constant 1.280000e+02 : f32
    %243 = vector.broadcast %cst_60 : f32 to vector<16x1xf32>
    %244 = arith.divf %242, %243 : vector<16x1xf32>
    %245 = vector.broadcast %244 : vector<16x1xf32> to vector<16x128xf32>
    %246 = arith.subf %238, %245 : vector<16x128xf32>
    %247 = arith.mulf %246, %246 : vector<16x128xf32>
    %cst_61 = arith.constant dense<0.000000e+00> : vector<16xf32>
    %248 = vector.multi_reduction <add>, %247, %cst_61 [1] : vector<16x128xf32> to vector<16xf32>
    %249 = vector.shape_cast %248 : vector<16xf32> to vector<16x1xf32>
    %cst_62 = arith.constant 1.280000e+02 : f32
    %250 = vector.broadcast %cst_62 : f32 to vector<16x1xf32>
    %251 = arith.divf %249, %250 : vector<16x1xf32>
    %252 = vector.broadcast %244 : vector<16x1xf32> to vector<16x128xf32>
    %253 = arith.subf %238, %252 : vector<16x128xf32>
    %cst_63 = arith.constant 9.99999974E-6 : f32
    %254 = vector.broadcast %cst_63 : f32 to vector<16x1xf32>
    %255 = arith.addf %251, %254 : vector<16x1xf32>
    %256 = math.rsqrt %255 : vector<16x1xf32>
    %257 = vector.broadcast %256 : vector<16x1xf32> to vector<16x128xf32>
    %258 = arith.mulf %253, %257 : vector<16x128xf32>
    %259 = vector.broadcast %239 : vector<1x128xf32> to vector<16x128xf32>
    %260 = arith.mulf %258, %259 : vector<16x128xf32>
    %261 = vector.broadcast %240 : vector<1x128xf32> to vector<16x128xf32>
    %262 = arith.addf %260, %261 : vector<16x128xf32>
    %c0_64 = arith.constant 0 : index
    %c0_65 = arith.constant 0 : index
    %263 = vector.load %arg5[%c0_64, %c0_65] : memref<8x128xf32, #tpu.memory_space<vmem>>, vector<8x128xf32>
    %264 = vector.extract_strided_slice %263 {offsets = [0, 0], sizes = [1, 128], strides = [1, 1]} : vector<8x128xf32> to vector<1x128xf32>
    %265 = vector.extract_strided_slice %263 {offsets = [1, 0], sizes = [1, 128], strides = [1, 1]} : vector<8x128xf32> to vector<1x128xf32>
    %cst_66 = arith.constant dense<0.000000e+00> : vector<16xf32>
    %266 = vector.multi_reduction <add>, %262, %cst_66 [1] : vector<16x128xf32> to vector<16xf32>
    %267 = vector.shape_cast %266 : vector<16xf32> to vector<16x1xf32>
    %cst_67 = arith.constant 1.280000e+02 : f32
    %268 = vector.broadcast %cst_67 : f32 to vector<16x1xf32>
    %269 = arith.divf %267, %268 : vector<16x1xf32>
    %270 = vector.broadcast %269 : vector<16x1xf32> to vector<16x128xf32>
    %271 = arith.subf %262, %270 : vector<16x128xf32>
    %272 = arith.mulf %271, %271 : vector<16x128xf32>
    %cst_68 = arith.constant dense<0.000000e+00> : vector<16xf32>
    %273 = vector.multi_reduction <add>, %272, %cst_68 [1] : vector<16x128xf32> to vector<16xf32>
    %274 = vector.shape_cast %273 : vector<16xf32> to vector<16x1xf32>
    %cst_69 = arith.constant 1.280000e+02 : f32
    %275 = vector.broadcast %cst_69 : f32 to vector<16x1xf32>
    %276 = arith.divf %274, %275 : vector<16x1xf32>
    %277 = vector.broadcast %269 : vector<16x1xf32> to vector<16x128xf32>
    %278 = arith.subf %262, %277 : vector<16x128xf32>
    %cst_70 = arith.constant 9.99999974E-6 : f32
    %279 = vector.broadcast %cst_70 : f32 to vector<16x1xf32>
    %280 = arith.addf %276, %279 : vector<16x1xf32>
    %281 = math.rsqrt %280 : vector<16x1xf32>
    %282 = vector.broadcast %281 : vector<16x1xf32> to vector<16x128xf32>
    %283 = arith.mulf %278, %282 : vector<16x128xf32>
    %284 = vector.broadcast %264 : vector<1x128xf32> to vector<16x128xf32>
    %285 = arith.mulf %283, %284 : vector<16x128xf32>
    %286 = vector.broadcast %265 : vector<1x128xf32> to vector<16x128xf32>
    %287 = arith.addf %285, %286 : vector<16x128xf32>
    %288 = arith.truncf %287 : vector<16x128xf32> to vector<16x128xbf16>
    %c0_71 = arith.constant 0 : index
    %c0_72 = arith.constant 0 : index
    %289 = vector.load %arg4[%c0_71, %c0_72] : memref<128x128xbf16, #tpu.memory_space<vmem>>, vector<128x128xbf16>
    %cst_73 = arith.constant dense<0.000000e+00> : vector<16x128xf32>
    %290 = tpu.matmul %288, %289, %cst_73 {dimension_numbers = #tpu.dot_dimension_numbers<[1], [0], [0], [1], [0, 0, 1, 1], [], []>} : vector<16x128xbf16>, vector<128x128xbf16>, vector<16x128xf32> -> vector<16x128xf32>
    %291 = vector.extract_strided_slice %263 {offsets = [2, 0], sizes = [1, 128], strides = [1, 1]} : vector<8x128xf32> to vector<1x128xf32>
    %292 = vector.broadcast %291 : vector<1x128xf32> to vector<16x128xf32>
    %293 = arith.addf %290, %292 : vector<16x128xf32>
    %cst_74 = arith.constant 0.000000e+00 : f32
    %294 = vector.broadcast %cst_74 : f32 to vector<16x128xf32>
    %295 = arith.maximumf %293, %294 : vector<16x128xf32>
    %cst_75 = arith.constant dense<0.000000e+00> : vector<16xf32>
    %296 = vector.multi_reduction <add>, %295, %cst_75 [1] : vector<16x128xf32> to vector<16xf32>
    %297 = vector.shape_cast %296 : vector<16xf32> to vector<16x1xf32>
    %cst_76 = arith.constant 1.280000e+02 : f32
    %298 = vector.broadcast %cst_76 : f32 to vector<16x1xf32>
    %299 = arith.divf %297, %298 : vector<16x1xf32>
    %300 = vector.broadcast %299 : vector<16x1xf32> to vector<16x128xf32>
    %301 = arith.subf %295, %300 : vector<16x128xf32>
    %302 = arith.mulf %301, %301 : vector<16x128xf32>
    %cst_77 = arith.constant dense<0.000000e+00> : vector<16xf32>
    %303 = vector.multi_reduction <add>, %302, %cst_77 [1] : vector<16x128xf32> to vector<16xf32>
    %304 = vector.shape_cast %303 : vector<16xf32> to vector<16x1xf32>
    %cst_78 = arith.constant 1.280000e+02 : f32
    %305 = vector.broadcast %cst_78 : f32 to vector<16x1xf32>
    %306 = arith.divf %304, %305 : vector<16x1xf32>
    %307 = vector.broadcast %299 : vector<16x1xf32> to vector<16x128xf32>
    %308 = arith.subf %295, %307 : vector<16x128xf32>
    %cst_79 = arith.constant 9.99999974E-6 : f32
    %309 = vector.broadcast %cst_79 : f32 to vector<16x1xf32>
    %310 = arith.addf %306, %309 : vector<16x1xf32>
    %311 = math.rsqrt %310 : vector<16x1xf32>
    %312 = vector.broadcast %311 : vector<16x1xf32> to vector<16x128xf32>
    %313 = arith.mulf %308, %312 : vector<16x128xf32>
    %314 = vector.broadcast %264 : vector<1x128xf32> to vector<16x128xf32>
    %315 = arith.mulf %313, %314 : vector<16x128xf32>
    %316 = vector.broadcast %265 : vector<1x128xf32> to vector<16x128xf32>
    %317 = arith.addf %315, %316 : vector<16x128xf32>
    %318 = vector.extract_strided_slice %263 {offsets = [3, 0], sizes = [1, 128], strides = [1, 1]} : vector<8x128xf32> to vector<1x128xf32>
    %319 = vector.broadcast %318 : vector<1x128xf32> to vector<16x128xf32>
    %320 = arith.mulf %317, %319 : vector<16x128xf32>
    %cst_80 = arith.constant dense<0.000000e+00> : vector<16xf32>
    %321 = vector.multi_reduction <add>, %320, %cst_80 [1] : vector<16x128xf32> to vector<16xf32>
    %322 = vector.shape_cast %321 : vector<16xf32> to vector<16x1xf32>
    %323 = vector.extract_strided_slice %263 {offsets = [4, 0], sizes = [1, 1], strides = [1, 1]} : vector<8x128xf32> to vector<1x1xf32>
    %324 = vector.broadcast %323 : vector<1x1xf32> to vector<16x1xf32>
    %325 = arith.addf %322, %324 : vector<16x1xf32>
    %326 = arith.negf %325 : vector<16x1xf32>
    %327 = math.exp %326 : vector<16x1xf32>
    %cst_81 = arith.constant 1.000000e+00 : f32
    %328 = vector.broadcast %cst_81 : f32 to vector<16x1xf32>
    %329 = arith.addf %328, %327 : vector<16x1xf32>
    %330 = arith.divf %328, %329 : vector<16x1xf32>
    %c0_82 = arith.constant 0 : index
    %c0_83 = arith.constant 0 : index
    %331 = vector.load %arg6[%c0_82, %c0_83] : memref<16x1xf32, #tpu.memory_space<vmem>>, vector<16x1xf32>
    tpu.vector_store %arg6[%c0_82, %c0_83], %330 {strides = array<i32>} : memref<16x1xf32, #tpu.memory_space<vmem>>, vector<16x1xf32>,
    return
  }
  func.func @transform_0(%arg0: i32) -> (i32, i32) {
    %c0_i32 = arith.constant 0 : i32
    %c0_i32_0 = arith.constant 0 : i32
    return %arg0, %c0_i32 : i32, i32
  }
  func.func @transform_1(%arg0: i32) -> (i32, i32, i32) {
    %c0_i32 = arith.constant 0 : i32
    %c0_i32_0 = arith.constant 0 : i32
    %c0_i32_1 = arith.constant 0 : i32
    %c0_i32_2 = arith.constant 0 : i32
    return %c0_i32, %c0_i32_0, %c0_i32_1 : i32, i32, i32
  }
  func.func @transform_2(%arg0: i32) -> (i32, i32, i32) {
    %c0_i32 = arith.constant 0 : i32
    %c0_i32_0 = arith.constant 0 : i32
    %c0_i32_1 = arith.constant 0 : i32
    %c0_i32_2 = arith.constant 0 : i32
    return %c0_i32, %c0_i32_0, %c0_i32_1 : i32, i32, i32
  }
  func.func @transform_3(%arg0: i32) -> (i32, i32) {
    %c0_i32 = arith.constant 0 : i32
    %c0_i32_0 = arith.constant 0 : i32
    %c0_i32_1 = arith.constant 0 : i32
    return %c0_i32, %c0_i32_0 : i32, i32
  }
  func.func @transform_4(%arg0: i32) -> (i32, i32) {
    %c0_i32 = arith.constant 0 : i32
    %c0_i32_0 = arith.constant 0 : i32
    %c0_i32_1 = arith.constant 0 : i32
    return %c0_i32, %c0_i32_0 : i32, i32
  }
  func.func @transform_5(%arg0: i32) -> (i32, i32) {
    %c0_i32 = arith.constant 0 : i32
    %c0_i32_0 = arith.constant 0 : i32
    return %arg0, %c0_i32 : i32, i32
  }
}

</mosaic_0001>

<bundles_post_ra>
// kernel: transformer_forward.1
= control target key start
LH: loop header
LB: loop body
LE: loop exit
PB: predicated region body
PF: predicated region fallthrough
CT: control target
= control target key end

     0   :  { %10 = vsyncpa [#allocation3], 0  ;;  %s5123_s0 = inlined_call_operand.vmem [shape: f32[16,128], index: 0, kind: input, shape index: {}]   ;;  %s5124_s1 = inlined_call_operand.hbm [shape: bf16[2,128,768], index: 1, kind: input, shape index: {}]   ;;  %s5125_s2 = inlined_call_operand.vmem [shape: f32[2,10,128], index: 2, kind: input, shape index: {}]   ;;  %s5126_s3 = inlined_call_operand.hbm [shape: bf16[128,128], index: 3, kind: input, shape index: {}]   ;;  %s5127_s4 = inlined_call_operand.vmem [shape: f32[8,128], index: 4, kind: input, shape index: {}]   ;;  %s5128_s5 = inlined_call_operand.vmem [shape: f32[16,1], index: 5, kind: output, shape index: {}]  }
   0x1   :  { %11 = vsyncpa [#allocation5], 0  ;;  %s4544_s18 = smov [#allocation2]  }
   0x2   :  { %s19_s19 = sshll.u32 %s4544_s18, 4  ;;  %s20_s19 = int_to_ptr.vmem [resolvable:$true] %s19_s19 }
   0x3   :  { %s4508_s20 = scalar_lea.vmem %s20_s19, 12288  ;;  %p4513_p1 = scmp.lt.s32.totalorder %s20_s19, %s20_s19 }
   0x4   :  { %p4509_p0 = scmp.ne.s32.totalorder %s20_s19, %s4508_s20  ;;  %p4514_p2 = scmp.lt.s32.totalorder %s4508_s20, %s4508_s20 }
   0x6   :  { %p4515_p3 = por %p4514_p2, %p4513_p1 }
   0x8   :  { %p4516_p4 = pnand %p4515_p3, %p4509_p0 }
   0xa   :  { %4519 = shalt.err (!%p4516_p4)
}
   0xb   :  { %s4545_s21 = smov 384   ;;  %s4546_s22 = smov 24  }
   0xc   :  { %25 = dma.hbm_to_vmem [thread:$0]  %s5124_s1, 12288, %s20_s19, [#allocation3], %s4545_s21, %s4545_s21, %s4546_s22  }
   0xd   :  { %s4547_s25 = smov [#allocation4]  }
   0xe   :  { %s33_s26 = sshll.u32 %s4547_s25, 4  ;;  %s34_s26 = int_to_ptr.vmem [resolvable:$true] %s33_s26 }
   0xf   :  { %s4528_s27 = scalar_lea.vmem %s34_s26, 1024  ;;  %p4533_p6 = scmp.lt.s32.totalorder %s34_s26, %s34_s26 }
  0x10   :  { %p4529_p5 = scmp.ne.s32.totalorder %s34_s26, %s4528_s27  ;;  %p4534_p7 = scmp.lt.s32.totalorder %s4528_s27, %s4528_s27 }
  0x12   :  { %p4535_p8 = por %p4534_p7, %p4533_p6 }
  0x14   :  { %p4536_p9 = pnand %p4535_p8, %p4529_p5 }
  0x16   :  { %4539 = shalt.err (!%p4536_p9)
}
  0x17   :  { %s4548_s28 = smov 64   ;;  %s4549_s29 = smov 4  }
  0x18   :  { %39 = dma.hbm_to_vmem [thread:$0]  %s5126_s3, 1024, %s34_s26, [#allocation5], %s4548_s28, %s4548_s28, %s4549_s29  }
  0x19   :  { %4540 = dma.done.wait [#allocation3], 12288  }
  0x1a   :  { %4541 = vsyncadd [#allocation3], 4294955008 }
  0x1b   :  { %4542 = dma.done.wait [#allocation5], 1024  }
  0x1c   :  { %4543 = vsyncadd [#allocation5], 4294966272  ;;  %v4550_v0 = vmov 0   ;;  %v4551_v1 = vmov 0.0   ;;  %v4282_v2 = vld [vmem:[#allocation2 + $0x154] ss:$24 sps:$4 sm:$0xff]   ;;  %v298_v29 = vlaneseq }
  0x1d   :  { %246 = vmatprep.mubr.bf16.mxu0 %v4550_v0  ;;  %3784 = vmatprep.subr.bf16.mxu1 %v4551_v1  ;;  %v4284_v3 = vld [vmem:[#allocation2 + $0x150] ss:$24 sps:$4 sm:$0xff]   ;;  %v4285_v4 = vld [vmem:[#allocation2 + $0x124] ss:$24 sps:$4 sm:$0xff]   ;;  %v4287_v5 = vld [vmem:[#allocation2 + $0x120] ss:$24 sps:$4 sm:$0xff]  }
  0x1e   :  { %214 = vmatprep.subr.bf16.mxu0 %v4282_v2  ;;  %v4288_v6 = vld [vmem:[#allocation2 + $0xf4] ss:$24 sps:$4 sm:$0xff]   ;;  %v4290_v7 = vld [vmem:[#allocation2 + $0xf0] ss:$24 sps:$4 sm:$0xff]   ;;  %v4291_v8 = vld [vmem:[#allocation2 + $0xc4] ss:$24 sps:$4 sm:$0xff]  }
  0x1f   :  { %215 = vmatpush1.bf16.msra.mxu0 %v4284_v3  ;;  %v4293_v9 = vld [vmem:[#allocation2 + $0xc0] ss:$24 sps:$4 sm:$0xff]   ;;  %v4294_v10 = vld [vmem:[#allocation2 + $0x94] ss:$24 sps:$4 sm:$0xff]   ;;  %v4296_v13 = vld [vmem:[#allocation2 + $0x90] ss:$24 sps:$4 sm:$0xff]  }
  0x20   :  { %216 = vmatprep.subr.bf16.mxu0 %v4285_v4  ;;  %v4306_v11 = vld [vmem:[#allocation2 + $0x158] ss:$24 sps:$4 sm:$0xff]   ;;  %v4307_v12 = vld [vmem:[#allocation2 + $0x128] ss:$24 sps:$4 sm:$0xff]   ;;  %v4297_v14 = vld [vmem:[#allocation2 + $0x64] ss:$24 sps:$4 sm:$0xff]  }
  0x21   :  { %3785 = vmatpush3.bf16.msra.mxu1 %v4306_v11  ;;  %v4308_v15 = vld [vmem:[#allocation2 + $0xf8] ss:$24 sps:$4 sm:$0xff]   ;;  %v4300_v17 = vld [vmem:[#allocation2 + $0x34] ss:$24 sps:$4 sm:$0xff]   ;;  %v4309_v18 = vld [vmem:[#allocation2 + $0xc8] ss:$24 sps:$4 sm:$0xff]  }
  0x22   :  { %3786 = vmatprep.subr.bf16.mxu1 %v4551_v1  ;;  %v4299_v16 = vld [vmem:[#allocation2 + $0x60] ss:$24 sps:$4 sm:$0xff]   ;;  %v4302_v19 = vld [vmem:[#allocation2 + $0x30] ss:$24 sps:$4 sm:$0xff]   ;;  %v4303_v20 = vld [vmem:[#allocation2 + $0x4] ss:$24 sps:$4 sm:$0xff]  }
  0x23   :  { %217 = vmatpush1.bf16.msra.mxu0 %v4287_v5  ;;  %v4310_v21 = vld [vmem:[#allocation2 + $0x98] ss:$24 sps:$4 sm:$0xff]   ;;  %v49_v23 = vld [vmem:[%s5123_s0] sm:$0xff]  ;;  %v50_v24 = vld [vmem:[%s5123_s0 + $0x8] sm:$0xff]  ;;  %vm4552_vm0 = vmmov 0   ;;  %v4616_v30 = vshrl.u32 %v298_v29, 7 }
  0x24   :  { %218 = vmatprep.subr.bf16.mxu0 %v4288_v6  ;;  %v4305_v22 = vld [vmem:[#allocation2] ss:$24 sps:$4 sm:$0xff]   ;;  %v85_v25 = vpack.c.bf16 %v50_v24, %v49_v23  ;;  %3800 = vmatprep.mubr.msk.bf16.mxu1 %vm4552_vm0, %v4551_v1  ;;  %vm400_vm1 = vcmask 261120   ;;  %s4553_s11 = smov 96   ;;  %s4554_s12 = smov 32   ;;  %vm869_vm2 = vcmask 1043456  }
  0x25   :  { %3787 = vmatpush3.bf16.msra.mxu1 %v4307_v12  ;;  %v4311_v26 = vld [vmem:[#allocation2 + $0x68] ss:$24 sps:$4 sm:$0xff]   ;;  %v4312_v27 = vld [vmem:[#allocation2 + $0x38] ss:$24 sps:$4 sm:$0xff]   ;;  %v4619_v31 = vsub.s32 1, %v4616_v30  ;;  %v4629_v35 = vsub.s32 0, %v4616_v30 }
  0x26   :  { %3788 = vmatprep.subr.bf16.mxu1 %v4551_v1  ;;  %v4313_v28 = vld [vmem:[#allocation2 + $0x8] ss:$24 sps:$4 sm:$0xff]   ;;  %v4654_v12 = vsub.s32 2, %v4616_v30  ;;  %vm769_vm3 = vcmask 64512   ;;  %vm1261_vm4 = vcmask 523264   ;;  %vm1264_vm5 = vcmask 785408  }
  0x27   :  { %219 = vmatpush1.bf16.msra.mxu0 %v4290_v7  ;;  %v4624_v32 = vld [vmem:[%s5125_s2] sm:$0xff]  ;;  %vm3490_vm6 = vcmask 7168  }
  0x28   :  { %220 = vmatprep.subr.bf16.mxu0 %v4291_v8  ;;  %v307_v33 = vrot.slane %v4624_v32, %v4619_v31  ;;  %v301_v38 = vrot.slane %v4624_v32, %v4629_v35 }
  0x29   :  { %3789 = vmatpush3.bf16.msra.mxu1 %v4308_v15 }
  0x2a   :  { %3790 = vmatprep.subr.bf16.mxu1 %v4551_v1 }
  0x2b   :  { %221 = vmatpush1.bf16.msra.mxu0 %v4293_v9 }
  0x2c   :  { %222 = vmatprep.subr.bf16.mxu0 %v4294_v10 }
  0x2d   :  { %3791 = vmatpush3.bf16.msra.mxu1 %v4309_v18 }
  0x2e   :  { %3792 = vmatprep.subr.bf16.mxu1 %v4551_v1 }
  0x2f   :  { %223 = vmatpush1.bf16.msra.mxu0 %v4296_v13 }
  0x30   :  { %224 = vmatprep.subr.bf16.mxu0 %v4297_v14 }
  0x31   :  { %3793 = vmatpush3.bf16.msra.mxu1 %v4310_v21 }
  0x32   :  { %3794 = vmatprep.subr.bf16.mxu1 %v4551_v1 }
  0x33   :  { %225 = vmatpush1.bf16.msra.mxu0 %v4299_v16 }
  0x34   :  { %226 = vmatprep.subr.bf16.mxu0 %v4300_v17 }
  0x35   :  { %3795 = vmatpush3.bf16.msra.mxu1 %v4311_v26 }
  0x36   :  { %3796 = vmatprep.subr.bf16.mxu1 %v4551_v1 }
  0x37   :  { %227 = vmatpush1.bf16.msra.mxu0 %v4302_v19 }
  0x38   :  { %228 = vmatprep.subr.bf16.mxu0 %v4303_v20  ;;  %v313_v20 = vrot.slane %v4624_v32, %v4654_v12 }
  0x39   :  { %3797 = vmatpush3.bf16.msra.mxu1 %v4312_v27 }
  0x3a   :  { %3798 = vmatprep.subr.bf16.mxu1 %v4551_v1 }
  0x3b   :  { %229 = vmatpush1.bf16.msra.mxu0 %v4305_v22 }
  0x3c   :  { %3804 = vmatprep.subr.bf16.mxu0 %v4551_v1 }
  0x3d   :  { %3799 = vmatpush3.bf16.msra.mxu1 %v4313_v28 }
  0x3e   :  { %247 = vmatmul.mubr.bf16.vlgmr.msra.gmra.mxu0 %v85_v25  ;;  %3810 = vmatprep.subr.bf16.mxu1 %v4551_v1 }
  0x3f   :  { %3806 = vmatprep.mubr.msk.bf16.mxu0 %vm4552_vm0, %v4551_v1 }
  0x40   :  { %3801 = vmatmul.mubr.bf16.vlgmr.msra.gmra.mxu1 %v85_v25 }
  0x41   :  { %3812 = vmatprep.mubr.msk.bf16.mxu1 %vm4552_vm0, %v4551_v1 }
  0xfe   :  { %v248_v34 = vpop.f32.mrf.mxu0 }
  0xff   :  { %v302_v44 = vadd.f32 %v301_v38, %v248_v34 }
 0x100   :  { %v250_v36 = vpop.f32.mrf.mxu0  ;;  %v291_v52 = vpop.f32.mrf.mxu1 }
 0x101   :  { %v308_v37 = vadd.f32 %v307_v33, %v250_v36  ;;  %v336_v49 = vpack.c.bf16 %v302_v44, %v302_v44  ;;  %v4668_v25 = vadd.f32 %v313_v20, %v291_v52 }
 0x102   :  { %v252_v39 = vpop.f32.mrf.mxu0  ;;  %v3802_v53 = vpop.f32.mrf.mxu1 }
 0x103   :  { %v364_v40 = vpack.c.bf16 %v308_v37, %v308_v37  ;;  %v303_v45 = vadd.f32 %v301_v38, %v252_v39  ;;  %v392_v36 = vpack.c.bf16 %v4668_v25, %v4668_v25 }
 0x104   :  { %v254_v41 = vpop.f32.mrf.mxu0  ;;  %v294_v54 = vpop.f32.mrf.mxu1 }
 0x105   :  { %v309_v42 = vadd.f32 %v307_v33, %v254_v41  ;;  %v405_v43 = vsel %vm400_vm1, %v364_v40, 0  ;;  %v4182_v50 = vpack.i.bf16 %v303_v45, %v302_v44  ;;  %v337_v51 = vpack.c.bf16 %v303_v45, %v303_v45 }
 0x106   :  { %3805 = vmatpush3.bf16.xpose.msra.mxu0 %v405_v43  ;;  %v3803_v55 = vpop.f32.mrf.mxu1  ;;  %v4670_v26 = vadd.f32 %v313_v20, %v294_v54  ;;  %v871_v40 = vsel %vm869_vm2, %v392_v36, 0 }
 0x107   :  { %v4177_v46 = vpack.i.bf16 %v309_v42, %v308_v37  ;;  %v365_v47 = vpack.c.bf16 %v309_v42, %v309_v42  ;;  %3816 = vmatprep.subr.bf16.mxu0 %v4551_v1 }
 0x108   :  { %v393_v37 = vpack.c.bf16 %v4670_v26, %v4670_v26 }
 0x109   :  { %4178 = vrot.lane.b32.xlu1 %v4177_v46, %s4548_s28  ;;  %4168 = vrot.lane.b32.xlu0 %v4177_v46, %s4553_s11  ;;  %v451_v48 = vsel %vm400_vm1, %v365_v47, 0 }
 0x10a   :  { %3811 = vmatpush3.bf16.xpose.msra.mxu1 %v451_v48  ;;  %v917_v41 = vsel %vm869_vm2, %v393_v37, 0 }
 0x10b   :  { %3822 = vmatprep.subr.bf16.mxu1 %v4551_v1 }
 0x10d   :  { %3807 = vmatmul.mubr.msk.bf16.vlgmr.msra.gmra.mxu0 %vm400_vm1, %v336_v49  ;;  %4183 = vrot.lane.b32.xlu1 %v4182_v50, %s4548_s28 }
 0x10e   :  { %4173 = vrot.lane.b32.xlu0 %v4182_v50, %s4553_s11  ;;  %3818 = vmatprep.mubr.msk.bf16.mxu0 %vm4552_vm0, %v4551_v1 }
 0x111   :  { %4193 = vrot.lane.b32.xlu1 %v4182_v50, %s4554_s12  ;;  %3813 = vmatmul.mubr.msk.bf16.vlgmr.msra.gmra.mxu1 %vm400_vm1, %v337_v51 }
 0x112   :  { %4188 = vrot.lane.b32.xlu0 %v4177_v46, %s4554_s12  ;;  %3824 = vmatprep.mubr.msk.bf16.mxu1 %vm4552_vm0, %v4551_v1 }
 0x17b   :  { %v4169_v56 = vpop.permute.xlu0 %4168  ;;  %v4179_v59 = vpop.permute.xlu1 %4178 }
 0x17c   :  { %v4171_v57 = vunpack.i.h.bf16 %v4169_v56  ;;  %v4170_v58 = vunpack.i.l.bf16 %v4169_v56  ;;  %v4181_v62 = vunpack.i.h.bf16 %v4179_v59  ;;  %v4180_v63 = vunpack.i.l.bf16 %v4179_v59 }
 0x17e   :  { %v367_v60 = vpack.c.bf16 %v4171_v57, %v4171_v57  ;;  %v366_v61 = vpack.c.bf16 %v4170_v58, %v4170_v58  ;;  %v369_v7 = vpack.c.bf16 %v4181_v62, %v4181_v62  ;;  %v368_v8 = vpack.c.bf16 %v4180_v63, %v4180_v63 }
 0x17f   :  { %v4184_v13 = vpop.permute.xlu1 %4183 }
 0x180   :  { %v4174_v2 = vpop.permute.xlu0 %4173  ;;  %v497_v3 = vsel %vm400_vm1, %v366_v61, 0  ;;  %v543_v4 = vsel %vm400_vm1, %v367_v60, 0  ;;  %v589_v16 = vsel %vm400_vm1, %v368_v8, 0  ;;  %v635_v17 = vsel %vm400_vm1, %v369_v7, 0 }
 0x181   :  { %3817 = vmatpush3.bf16.xpose.msra.mxu0 %v497_v3  ;;  %3823 = vmatpush3.bf16.xpose.msra.mxu1 %v543_v4  ;;  %v4176_v5 = vunpack.i.h.bf16 %v4174_v2  ;;  %v4175_v6 = vunpack.i.l.bf16 %v4174_v2  ;;  %v4186_v18 = vunpack.i.h.bf16 %v4184_v13  ;;  %v4185_v19 = vunpack.i.l.bf16 %v4184_v13 }
 0x182   :  { %3828 = vmatprep.subr.bf16.mxu0 %v4551_v1  ;;  %3834 = vmatprep.subr.bf16.mxu1 %v4551_v1 }
 0x183   :  { %v339_v10 = vpack.c.bf16 %v4176_v5, %v4176_v5  ;;  %v338_v11 = vpack.c.bf16 %v4175_v6, %v4175_v6  ;;  %v341_v23 = vpack.c.bf16 %v4186_v18, %v4186_v18  ;;  %v340_v24 = vpack.c.bf16 %v4185_v19, %v4185_v19  ;;  %v4194_v27 = vpop.permute.xlu1 %4193 }
 0x184   :  { %v4189_v9 = vpop.permute.xlu0 %4188  ;;  %v4196_v33 = vunpack.i.h.bf16 %v4194_v27  ;;  %v4195_v34 = vunpack.i.l.bf16 %v4194_v27 }
 0x185   :  { %v4191_v14 = vunpack.i.h.bf16 %v4189_v9  ;;  %v4190_v15 = vunpack.i.l.bf16 %v4189_v9 }
 0x186   :  { %v343_v38 = vpack.c.bf16 %v4196_v33, %v4196_v33  ;;  %v342_v39 = vpack.c.bf16 %v4195_v34, %v4195_v34 }
 0x187   :  { %v371_v21 = vpack.c.bf16 %v4191_v14, %v4191_v14  ;;  %v370_v22 = vpack.c.bf16 %v4190_v15, %v4190_v15 }
 0x188   :  { %3819 = vmatmul.mubr.msk.bf16.vlgmr.msra.gmra.mxu0 %vm400_vm1, %v338_v11  ;;  %3825 = vmatmul.mubr.msk.bf16.vlgmr.msra.gmra.mxu1 %vm400_vm1, %v339_v10 }
 0x189   :  { %3829 = vmatpush3.bf16.xpose.msra.mxu0 %v589_v16  ;;  %3835 = vmatpush3.bf16.xpose.msra.mxu1 %v635_v17  ;;  %v681_v28 = vsel %vm400_vm1, %v370_v22, 0  ;;  %v727_v29 = vsel %vm400_vm1, %v371_v21, 0 }
 0x18a   :  { %3830 = vmatprep.mubr.msk.bf16.mxu0 %vm4552_vm0, %v4551_v1  ;;  %3836 = vmatprep.mubr.msk.bf16.mxu1 %vm4552_vm0, %v4551_v1 }
 0x18b   :  { %3840 = vmatprep.subr.bf16.mxu0 %v4551_v1  ;;  %3846 = vmatprep.subr.bf16.mxu1 %v4551_v1 }
 0x190   :  { %3831 = vmatmul.mubr.msk.bf16.vlgmr.msra.gmra.mxu0 %vm400_vm1, %v340_v24  ;;  %3837 = vmatmul.mubr.msk.bf16.vlgmr.msra.gmra.mxu1 %vm400_vm1, %v341_v23  ;;  %v4706_v24 = vpack.i.bf16 %v4670_v26, %v4668_v25 }
 0x191   :  { %3841 = vmatpush3.bf16.xpose.msra.mxu0 %v681_v28  ;;  %3847 = vmatpush3.bf16.xpose.msra.mxu1 %v727_v29 }
 0x192   :  { %3842 = vmatprep.mubr.msk.bf16.mxu0 %vm4552_vm0, %v4551_v1  ;;  %3848 = vmatprep.mubr.msk.bf16.mxu1 %vm4552_vm0, %v4551_v1 }
 0x193   :  { %3852 = vmatprep.subr.bf16.mxu0 %v4551_v1  ;;  %3858 = vmatprep.subr.bf16.mxu1 %v4551_v1 }
 0x198   :  { %3843 = vmatmul.mubr.msk.bf16.vlgmr.msra.gmra.mxu0 %vm400_vm1, %v342_v39  ;;  %3849 = vmatmul.mubr.msk.bf16.vlgmr.msra.gmra.mxu1 %vm400_vm1, %v343_v38 }
 0x199   :  { %3853 = vmatpush3.bf16.msra.mxu0 %v871_v40  ;;  %3859 = vmatpush3.bf16.msra.mxu1 %v917_v41 }
 0x19a   :  { %3860 = vmatprep.mubr.msk.bf16.mxu1 %vm4552_vm0, %v4551_v1  ;;  %3870 = vmatprep.subr.bf16.mxu1 %v4551_v1 }
 0x19b   :  { %3854 = vmatprep.mubr.msk.bf16.mxu0 %vm4552_vm0, %v4551_v1  ;;  %3864 = vmatprep.subr.bf16.mxu0 %v4551_v1 }
 0x1cd   :  { %v441_v42 = vpop.f32.mrf.mxu0 }
 0x1ce   :  { %v770_v43 = vsel %vm769_vm3, %v441_v42, -inf }
 0x1cf   :  { %v3808_v44 = vpop.f32.mrf.mxu0  ;;  %771 = vmax.xlane.f32.xlu0 %v770_v43 }
 0x1d1   :  { %v444_v45 = vpop.f32.mrf.mxu0  ;;  %v487_v46 = vpop.f32.mrf.mxu1 }
 0x1d2   :  { %v773_v47 = vsel %vm769_vm3, %v487_v46, -inf }
 0x1d3   :  { %v3809_v48 = vpop.f32.mrf.mxu0  ;;  %774 = vmax.xlane.f32.xlu1 %v773_v47  ;;  %v3814_v49 = vpop.f32.mrf.mxu1 }
 0x1d5   :  { %v490_v50 = vpop.f32.mrf.mxu1 }
 0x1d7   :  { %v3815_v51 = vpop.f32.mrf.mxu1 }
 0x248   :  { %v533_v52 = vpop.f32.mrf.mxu0  ;;  %v579_v53 = vpop.f32.mrf.mxu1 }
 0x249   :  { %v776_v54 = vsel %vm769_vm3, %v533_v52, -inf  ;;  %v779_v59 = vsel %vm769_vm3, %v579_v53, -inf }
 0x24a   :  { %777 = vmax.xlane.f32.xlu0 %v776_v54  ;;  %v3820_v55 = vpop.f32.mrf.mxu0  ;;  %v3826_v56 = vpop.f32.mrf.mxu1 }
 0x24c   :  { %v536_v57 = vpop.f32.mrf.mxu0  ;;  %v582_v58 = vpop.f32.mrf.mxu1 }
 0x24e   :  { %v3821_v60 = vpop.f32.mrf.mxu0  ;;  %780 = vmax.xlane.f32.xlu0 %v779_v59  ;;  %v3827_v61 = vpop.f32.mrf.mxu1 }
 0x250   :  { %v625_v62 = vpop.f32.mrf.mxu0  ;;  %v671_v63 = vpop.f32.mrf.mxu1 }
 0x251   :  { %v782_v2 = vsel %vm769_vm3, %v625_v62, -inf  ;;  %v785_v3 = vsel %vm769_vm3, %v671_v63, -inf }
 0x252   :  { %v3832_v4 = vpop.f32.mrf.mxu0  ;;  %783 = vmax.xlane.f32.xlu1 %v782_v2  ;;  %786 = vmax.xlane.f32.xlu0 %v785_v3  ;;  %v3838_v5 = vpop.f32.mrf.mxu1 }
 0x254   :  { %v628_v6 = vpop.f32.mrf.mxu0  ;;  %v674_v7 = vpop.f32.mrf.mxu1 }
 0x256   :  { %v3833_v8 = vpop.f32.mrf.mxu0  ;;  %v3839_v9 = vpop.f32.mrf.mxu1 }
 0x258   :  { %v717_v10 = vpop.f32.mrf.mxu0  ;;  %v763_v11 = vpop.f32.mrf.mxu1 }
 0x259   :  { %v788_v13 = vsel %vm769_vm3, %v717_v10, -inf  ;;  %v791_v15 = vsel %vm769_vm3, %v763_v11, -inf  ;;  %v772_v29 = vpop.xlane.xlu0 %771 }
 0x25a   :  { %v3844_v14 = vpop.f32.mrf.mxu0  ;;  %789 = vmax.xlane.f32.xlu1 %v788_v13  ;;  %792 = vmax.xlane.f32.xlu0 %v791_v15  ;;  %v3850_v16 = vpop.f32.mrf.mxu1  ;;  %v794_v33 = vsub.f32 %v441_v42, %v772_v29 }
 0x25c   :  { %v720_v17 = vpop.f32.mrf.mxu0  ;;  %v775_v18 = vpop.xlane.xlu1 %774  ;;  %v802_v34 = vmul.f32 1.442695, %v794_v33 }
 0x25d   :  { %v795_v19 = vsub.f32 %v487_v46, %v775_v18  ;;  %v766_v20 = vpop.f32.mrf.mxu1 }
 0x25e   :  { %v3845_v21 = vpop.f32.mrf.mxu0 }
 0x25f   :  { %v804_v22 = vmul.f32 1.442695, %v795_v19  ;;  %v3851_v23 = vpop.f32.mrf.mxu1 }
 0x261   :  { %4402 = vpow2.f32 %v804_v22 }
 0x262   :  { %4404 = vpow2.f32 %v802_v34 }
 0x26b   :  { %4198 = vrot.lane.b32.xlu1 %v4706_v24, %s4553_s11 }
 0x26e   :  { %v4403_v27 = vpop.eup %4402 }
 0x26f   :  { %v821_v28 = vsel %vm769_vm3, %v4403_v27, 0.0  ;;  %v4711_v36 = vpop.eup %4404 }
 0x270   :  { %822 = vadd.xlane.f32.xlu0 %v821_v28  ;;  %v818_v37 = vsel %vm769_vm3, %v4711_v36, 0.0 }
 0x28f   :  { %819 = vadd.xlane.f32.xlu1 %v818_v37 }
 0x2d3   :  { %v778_v38 = vpop.xlane.xlu0 %777 }
 0x2d4   :  { %v796_v25 = vsub.f32 %v533_v52, %v778_v38 }
 0x2d6   :  { %v806_v26 = vmul.f32 1.442695, %v796_v25 }
 0x2d7   :  { %v781_v39 = vpop.xlane.xlu0 %780 }
 0x2d8   :  { %4406 = vpow2.f32 %v806_v26  ;;  %v797_v40 = vsub.f32 %v579_v53, %v781_v39 }
 0x2da   :  { %v808_v41 = vmul.f32 1.442695, %v797_v40 }
 0x2db   :  { %v784_v43 = vpop.xlane.xlu1 %783  ;;  %v787_v44 = vpop.xlane.xlu0 %786 }
 0x2dc   :  { %4408 = vpow2.f32 %v808_v41  ;;  %v798_v45 = vsub.f32 %v625_v62, %v784_v43  ;;  %v799_v42 = vsub.f32 %v671_v63, %v787_v44 }
 0x2de   :  { %v810_v46 = vmul.f32 1.442695, %v798_v45  ;;  %v812_v47 = vmul.f32 1.442695, %v799_v42 }
 0x2e0   :  { %4410 = vpow2.f32 %v810_v46 }
 0x2e1   :  { %4412 = vpow2.f32 %v812_v47 }
 0x2e3   :  { %v790_v48 = vpop.xlane.xlu1 %789  ;;  %v793_v50 = vpop.xlane.xlu0 %792 }
 0x2e4   :  { %v800_v49 = vsub.f32 %v717_v10, %v790_v48  ;;  %v801_v54 = vsub.f32 %v763_v11, %v793_v50 }
 0x2e5   :  { %v4407_v51 = vpop.eup %4406 }
 0x2e6   :  { %v814_v52 = vmul.f32 1.442695, %v800_v49  ;;  %v824_v55 = vsel %vm769_vm3, %v4407_v51, 0.0  ;;  %v816_v56 = vmul.f32 1.442695, %v801_v54 }
 0x2e7   :  { %825 = vadd.xlane.f32.xlu1 %v824_v55  ;;  %v4199_v5 = vpop.permute.xlu1 %4198 }
 0x2e8   :  { %4414 = vpow2.f32 %v814_v52  ;;  %v4201_v6 = vunpack.i.h.bf16 %v4199_v5  ;;  %v4200_v14 = vunpack.i.l.bf16 %v4199_v5  ;;  %v4315_v5 = vld [vmem:[#allocation2 + $0x12c] ss:$24 sps:$4 sm:$0xff]  }
 0x2e9   :  { %v4409_v53 = vpop.eup %4408  ;;  %4416 = vpow2.f32 %v816_v56 }
 0x2ea   :  { %v827_v57 = vsel %vm769_vm3, %v4409_v53, 0.0  ;;  %v395_v8 = vpack.c.bf16 %v4201_v6, %v4201_v6  ;;  %v394_v16 = vpack.c.bf16 %v4200_v14, %v4200_v14  ;;  %v4316_v6 = vld [vmem:[#allocation2 + $0xfc] ss:$24 sps:$4 sm:$0xff]  }
 0x2eb   :  { %828 = vadd.xlane.f32.xlu0 %v827_v57 }
 0x2ec   :  { %v1009_v11 = vsel %vm869_vm2, %v395_v8, 0  ;;  %v963_v19 = vsel %vm869_vm2, %v394_v16, 0  ;;  %v4319_v16 = vld [vmem:[#allocation2 + $0x6c] ss:$24 sps:$4 sm:$0xff]  }
 0x2ed   :  { %v4717_v58 = vpop.eup %4410 }
 0x2ee   :  { %v4719_v59 = vpop.eup %4412  ;;  %v830_v60 = vsel %vm769_vm3, %v4717_v58, 0.0 }
 0x2ef   :  { %831 = vadd.xlane.f32.xlu1 %v830_v60  ;;  %v833_v61 = vsel %vm769_vm3, %v4719_v59, 0.0 }
 0x2f0   :  { %834 = vadd.xlane.f32.xlu0 %v833_v61 }
 0x2f5   :  { %v4725_v62 = vpop.eup %4414 }
 0x2f6   :  { %v4727_v63 = vpop.eup %4416  ;;  %v836_v2 = vsel %vm769_vm3, %v4725_v62, 0.0 }
 0x2f7   :  { %837 = vadd.xlane.f32.xlu1 %v836_v2  ;;  %v839_v3 = vsel %vm769_vm3, %v4727_v63, 0.0 }
 0x2f8   :  { %840 = vadd.xlane.f32.xlu0 %v839_v3 }
 0x2f9   :  { %v823_v4 = vpop.xlane.xlu0 %822 }
 0x2fa   :  { %4418 = vrcp.f32 %v823_v4  ;;  %v4314_v4 = vld [vmem:[#allocation2 + $0x15c] ss:$24 sps:$4 sm:$0xff]  }
 0x307   :  { %v4419_v7 = vpop.eup %4418 }
 0x308   :  { %4208 = vrot.lane.b32.xlu1 %v4706_v24, %s4554_s12  ;;  %v851_v9 = vmul.f32 %v4419_v7, %v4403_v27 }
 0x30a   :  { %v859_v10 = vpack.c.bf16 %v851_v9, %v851_v9 }
 0x30c   :  { %3861 = vmatmul.mubr.msk.bf16.vlgmr.msra.gmra.mxu1 %vm769_vm3, %v859_v10 }
 0x30d   :  { %3871 = vmatpush3.bf16.msra.mxu1 %v1009_v11  ;;  %3872 = vmatprep.mubr.msk.bf16.mxu1 %vm4552_vm0, %v4551_v1  ;;  %v4317_v11 = vld [vmem:[#allocation2 + $0xcc] ss:$24 sps:$4 sm:$0xff]  }
 0x30e   :  { %4203 = vrot.lane.b32.xlu0 %v4706_v24, %s4548_s28  ;;  %3882 = vmatprep.subr.bf16.mxu1 %v4551_v1 }
 0x318   :  { %v820_v13 = vpop.xlane.xlu1 %819 }
 0x319   :  { %4420 = vrcp.f32 %v820_v13  ;;  %v4318_v13 = vld [vmem:[#allocation2 + $0x9c] ss:$24 sps:$4 sm:$0xff]  }
 0x326   :  { %v4421_v15 = vpop.eup %4420 }
 0x327   :  { %v850_v17 = vmul.f32 %v4421_v15, %v4711_v36 }
 0x329   :  { %v858_v18 = vpack.c.bf16 %v850_v17, %v850_v17 }
 0x32b   :  { %3855 = vmatmul.mubr.msk.bf16.vlgmr.msra.gmra.mxu0 %vm769_vm3, %v858_v18 }
 0x32c   :  { %3865 = vmatpush3.bf16.msra.mxu0 %v963_v19  ;;  %3866 = vmatprep.mubr.msk.bf16.mxu0 %vm4552_vm0, %v4551_v1 }
 0x32d   :  { %3876 = vmatprep.subr.bf16.mxu0 %v4551_v1 }
 0x370   :  { %v826_v20 = vpop.xlane.xlu1 %825 }
 0x371   :  { %4422 = vrcp.f32 %v826_v20  ;;  %v4320_v20 = vld [vmem:[#allocation2 + $0x3c] ss:$24 sps:$4 sm:$0xff]  }
 0x374   :  { %v829_v21 = vpop.xlane.xlu0 %828 }
 0x375   :  { %4424 = vrcp.f32 %v829_v21 }
 0x378   :  { %v832_v22 = vpop.xlane.xlu1 %831 }
 0x379   :  { %4426 = vrcp.f32 %v832_v22  ;;  %v835_v23 = vpop.xlane.xlu0 %834 }
 0x37a   :  { %4428 = vrcp.f32 %v835_v23 }
 0x37e   :  { %v4423_v24 = vpop.eup %4422 }
 0x37f   :  { %v852_v27 = vmul.f32 %v4423_v24, %v4407_v51 }
 0x380   :  { %v838_v28 = vpop.xlane.xlu1 %837 }
 0x381   :  { %4430 = vrcp.f32 %v838_v28  ;;  %v841_v29 = vpop.xlane.xlu0 %840  ;;  %v860_v33 = vpack.c.bf16 %v852_v27, %v852_v27  ;;  %v4321_v28 = vld [vmem:[#allocation2 + $0xc] ss:$24 sps:$4 sm:$0xff]  }
 0x382   :  { %v4425_v34 = vpop.eup %4424  ;;  %4432 = vrcp.f32 %v841_v29 }
 0x383   :  { %3867 = vmatmul.mubr.msk.bf16.vlgmr.msra.gmra.mxu0 %vm769_vm3, %v860_v33  ;;  %v853_v36 = vmul.f32 %v4425_v34, %v4409_v53 }
 0x384   :  { %v4209_v37 = vpop.permute.xlu1 %4208  ;;  %3878 = vmatprep.mubr.msk.bf16.mxu0 %vm4552_vm0, %v4551_v1 }
 0x385   :  { %v4204_v38 = vpop.permute.xlu0 %4203  ;;  %v861_v25 = vpack.c.bf16 %v853_v36, %v853_v36  ;;  %v4210_v39 = vunpack.i.l.bf16 %v4209_v37  ;;  %v4211_v44 = vunpack.i.h.bf16 %v4209_v37 }
 0x386   :  { %v4427_v26 = vpop.eup %4426  ;;  %v4206_v40 = vunpack.i.h.bf16 %v4204_v38  ;;  %v4205_v41 = vunpack.i.l.bf16 %v4204_v38 }
 0x387   :  { %v4429_v43 = vpop.eup %4428  ;;  %3873 = vmatmul.mubr.msk.bf16.vlgmr.msra.gmra.mxu1 %vm769_vm3, %v861_v25  ;;  %v854_v46 = vmul.f32 %v4427_v26, %v4717_v58  ;;  %v398_v48 = vpack.c.bf16 %v4210_v39, %v4210_v39  ;;  %v399_v51 = vpack.c.bf16 %v4211_v44, %v4211_v44 }
 0x388   :  { %v397_v45 = vpack.c.bf16 %v4206_v40, %v4206_v40  ;;  %v396_v42 = vpack.c.bf16 %v4205_v41, %v4205_v41  ;;  %3884 = vmatprep.mubr.msk.bf16.mxu1 %vm4552_vm0, %v4551_v1  ;;  %v855_v47 = vmul.f32 %v4429_v43, %v4719_v59 }
 0x389   :  { %v862_v54 = vpack.c.bf16 %v854_v46, %v854_v46  ;;  %v1147_v56 = vsel %vm869_vm2, %v398_v48, 0  ;;  %v1193_v57 = vsel %vm869_vm2, %v399_v51, 0 }
 0x38a   :  { %v1055_v49 = vsel %vm869_vm2, %v396_v42, 0  ;;  %v1101_v50 = vsel %vm869_vm2, %v397_v45, 0  ;;  %v863_v52 = vpack.c.bf16 %v855_v47, %v855_v47 }
 0x38b   :  { %3877 = vmatpush3.bf16.msra.mxu0 %v1055_v49  ;;  %3883 = vmatpush3.bf16.msra.mxu1 %v1101_v50 }
 0x38c   :  { %3888 = vmatprep.subr.bf16.mxu0 %v4551_v1  ;;  %3894 = vmatprep.subr.bf16.mxu1 %v4551_v1 }
 0x38e   :  { %v4431_v55 = vpop.eup %4430  ;;  %3879 = vmatmul.mubr.msk.bf16.vlgmr.msra.gmra.mxu0 %vm769_vm3, %v862_v54 }
 0x38f   :  { %v4433_v53 = vpop.eup %4432  ;;  %3889 = vmatpush3.bf16.msra.mxu0 %v1147_v56  ;;  %3885 = vmatmul.mubr.msk.bf16.vlgmr.msra.gmra.mxu1 %vm769_vm3, %v863_v52  ;;  %v856_v58 = vmul.f32 %v4431_v55, %v4725_v62 }
 0x390   :  { %3895 = vmatpush3.bf16.msra.mxu1 %v1193_v57  ;;  %3890 = vmatprep.mubr.msk.bf16.mxu0 %vm4552_vm0, %v4551_v1  ;;  %v857_v59 = vmul.f32 %v4433_v53, %v4727_v63 }
 0x391   :  { %3896 = vmatprep.mubr.msk.bf16.mxu1 %vm4552_vm0, %v4551_v1  ;;  %3900 = vmatprep.subr.bf16.mxu0 %v4551_v1  ;;  %v864_v60 = vpack.c.bf16 %v856_v58, %v856_v58 }
 0x392   :  { %3920 = vmatprep.subr.bf16.mxu1 %v4551_v1  ;;  %v865_v61 = vpack.c.bf16 %v857_v59, %v857_v59 }
 0x396   :  { %3891 = vmatmul.mubr.msk.bf16.vlgmr.msra.gmra.mxu0 %vm769_vm3, %v864_v60 }
 0x397   :  { %3897 = vmatmul.mubr.msk.bf16.vlgmr.msra.gmra.mxu1 %vm769_vm3, %v865_v61  ;;  %3916 = vmatprep.mubr.msk.bf16.mxu0 %vm4552_vm0, %v4551_v1 }
 0x398   :  { %3936 = vmatprep.mubr.msk.bf16.mxu1 %vm4552_vm0, %v4551_v1  ;;  %3901 = vmatpush3.bf16.msra.mxu0 %v4314_v4 }
 0x399   :  { %3902 = vmatprep.subr.bf16.mxu0 %v4551_v1 }
 0x39c   :  { %3903 = vmatpush3.bf16.msra.mxu0 %v4315_v5 }
 0x39d   :  { %3904 = vmatprep.subr.bf16.mxu0 %v4551_v1 }
 0x3a0   :  { %3905 = vmatpush3.bf16.msra.mxu0 %v4316_v6 }
 0x3a1   :  { %3906 = vmatprep.subr.bf16.mxu0 %v4551_v1 }
 0x3a4   :  { %3907 = vmatpush3.bf16.msra.mxu0 %v4317_v11 }
 0x3a5   :  { %3908 = vmatprep.subr.bf16.mxu0 %v4551_v1 }
 0x3a8   :  { %3909 = vmatpush3.bf16.msra.mxu0 %v4318_v13  ;;  %v4499_v13 = vld [vmem:[%s5123_s0 + $0x8] sm:$0xff] }
 0x3a9   :  { %3910 = vmatprep.subr.bf16.mxu0 %v4551_v1 }
 0x3ac   :  { %3911 = vmatpush3.bf16.msra.mxu0 %v4319_v16 }
 0x3ad   :  { %3912 = vmatprep.subr.bf16.mxu0 %v4551_v1 }
 0x3b0   :  { %3913 = vmatpush3.bf16.msra.mxu0 %v4320_v20 }
 0x3b1   :  { %3914 = vmatprep.subr.bf16.mxu0 %v4551_v1 }
 0x3b4   :  { %3915 = vmatpush3.bf16.msra.mxu0 %v4321_v28  ;;  %v4325_v28 = vld [vmem:[#allocation2 + $0xd0] ss:$24 sps:$4 sm:$0xff]  }
 0x3b5   :  { %3940 = vmatprep.subr.bf16.mxu0 %v4551_v1 }
 0x3cc   :  { %v4778_v62 = vpop.f32.mrf.mxu1 }
 0x3ce   :  { %v3862_v2 = vpop.f32.mrf.mxu1 }
 0x3d0   :  { %v956_v63 = vpop.f32.mrf.mxu1 }
 0x3d2   :  { %v3863_v3 = vpop.f32.mrf.mxu1 }
 0x3d3   :  { %v4801_v3 = vsub.s32 3, %v4616_v30 }
 0x3eb   :  { %v907_v7 = vpop.f32.mrf.mxu0 }
 0x3ed   :  { %v3856_v8 = vpop.f32.mrf.mxu0 }
 0x3ef   :  { %v910_v9 = vpop.f32.mrf.mxu0 }
 0x3f1   :  { %v3857_v10 = vpop.f32.mrf.mxu0 }
 0x443   :  { %v999_v14 = vpop.f32.mrf.mxu0 }
 0x445   :  { %v3868_v15 = vpop.f32.mrf.mxu0 }
 0x446   :  { %v4322_v15 = vld [vmem:[#allocation2 + $0x160] ss:$24 sps:$4 sm:$0xff]  }
 0x447   :  { %v1002_v17 = vpop.f32.mrf.mxu0  ;;  %v1045_v18 = vpop.f32.mrf.mxu1  ;;  %3921 = vmatpush3.bf16.msra.mxu1 %v4322_v15 }
 0x448   :  { %v4212_v19 = vpack.i.bf16 %v1045_v18, %v999_v14  ;;  %3922 = vmatprep.subr.bf16.mxu1 %v4551_v1 }
 0x449   :  { %v3869_v21 = vpop.f32.mrf.mxu0  ;;  %v3874_v22 = vpop.f32.mrf.mxu1 }
 0x44a   :  { %4213 = vrot.lane.b32.xlu1 %v4212_v19, %s4554_s12 }
 0x44b   :  { %v1048_v23 = vpop.f32.mrf.mxu1 }
 0x44d   :  { %v3875_v24 = vpop.f32.mrf.mxu1 }
 0x44e   :  { %v1091_v27 = vpop.f32.mrf.mxu0  ;;  %v4323_v24 = vld [vmem:[#allocation2 + $0x130] ss:$24 sps:$4 sm:$0xff]  }
 0x44f   :  { %v1137_v29 = vpop.f32.mrf.mxu1  ;;  %3923 = vmatpush3.bf16.msra.mxu1 %v4323_v24  ;;  %v4341_v24 = vld [vmem:[#allocation2 + $0x2d8] ss:$24 sps:$4 sm:$0xff]  }
 0x450   :  { %v3880_v33 = vpop.f32.mrf.mxu0  ;;  %v4217_v34 = vpack.i.bf16 %v1137_v29, %v1091_v27  ;;  %3924 = vmatprep.subr.bf16.mxu1 %v4551_v1  ;;  %v4324_v27 = vld [vmem:[#allocation2 + $0x100] ss:$24 sps:$4 sm:$0xff]  }
 0x451   :  { %v3886_v36 = vpop.f32.mrf.mxu1  ;;  %v4326_v29 = vld [vmem:[#allocation2 + $0xa0] ss:$24 sps:$4 sm:$0xff]   ;;  %v4327_v33 = vld [vmem:[#allocation2 + $0x70] ss:$24 sps:$4 sm:$0xff]  }
 0x452   :  { %v1094_v37 = vpop.f32.mrf.mxu0  ;;  %4218 = vrot.lane.b32.xlu0 %v4217_v34, %s4548_s28  ;;  %v4328_v34 = vld [vmem:[#allocation2 + $0x40] ss:$24 sps:$4 sm:$0xff]   ;;  %v4329_v36 = vld [vmem:[#allocation2 + $0x10] ss:$24 sps:$4 sm:$0xff]  }
 0x453   :  { %v1140_v38 = vpop.f32.mrf.mxu1  ;;  %3925 = vmatpush3.bf16.msra.mxu1 %v4324_v27  ;;  %v4330_v37 = vld [vmem:[#allocation2 + $0x164] ss:$24 sps:$4 sm:$0xff]  }
 0x454   :  { %v3881_v25 = vpop.f32.mrf.mxu0  ;;  %3926 = vmatprep.subr.bf16.mxu1 %v4551_v1  ;;  %v4331_v38 = vld [vmem:[#allocation2 + $0x134] ss:$24 sps:$4 sm:$0xff]  }
 0x455   :  { %v3887_v26 = vpop.f32.mrf.mxu1  ;;  %v4332_v25 = vld [vmem:[#allocation2 + $0x104] ss:$24 sps:$4 sm:$0xff]  }
 0x456   :  { %v1183_v39 = vpop.f32.mrf.mxu0  ;;  %v4333_v26 = vld [vmem:[#allocation2 + $0xd4] ss:$24 sps:$4 sm:$0xff]  }
 0x457   :  { %v1229_v40 = vpop.f32.mrf.mxu1  ;;  %3927 = vmatpush3.bf16.msra.mxu1 %v4325_v28 }
 0x458   :  { %v3892_v41 = vpop.f32.mrf.mxu0  ;;  %v4222_v43 = vpack.i.bf16 %v1229_v40, %v1183_v39  ;;  %3928 = vmatprep.subr.bf16.mxu1 %v4551_v1  ;;  %v4334_v39 = vld [vmem:[#allocation2 + $0xa4] ss:$24 sps:$4 sm:$0xff]  }
 0x459   :  { %v3898_v44 = vpop.f32.mrf.mxu1 }
 0x45a   :  { %v1186_v45 = vpop.f32.mrf.mxu0  ;;  %4223 = vrot.lane.b32.xlu1 %v4222_v43, %s4553_s11 }
 0x45b   :  { %v1232_v42 = vpop.f32.mrf.mxu1  ;;  %3929 = vmatpush3.bf16.msra.mxu1 %v4326_v29 }
 0x45c   :  { %v3893_v46 = vpop.f32.mrf.mxu0  ;;  %3930 = vmatprep.subr.bf16.mxu1 %v4551_v1 }
 0x45d   :  { %v3899_v47 = vpop.f32.mrf.mxu1  ;;  %v1404_v46 = vsub.s32 6, %v4616_v30 }
 0x45f   :  { %3931 = vmatpush3.bf16.msra.mxu1 %v4327_v33 }
 0x460   :  { %3932 = vmatprep.subr.bf16.mxu1 %v4551_v1 }
 0x463   :  { %3933 = vmatpush3.bf16.msra.mxu1 %v4328_v34 }
 0x464   :  { %3934 = vmatprep.subr.bf16.mxu1 %v4551_v1 }
 0x467   :  { %3935 = vmatpush3.bf16.msra.mxu1 %v4329_v36 }
 0x4bc   :  { %v4214_v48 = vpop.permute.xlu1 %4213 }
 0x4bd   :  { %v4216_v50 = vunpack.i.h.bf16 %v4214_v48  ;;  %v4215_v51 = vunpack.i.l.bf16 %v4214_v48 }
 0x4bf   :  { %v1260_v56 = vsel %vm400_vm1, %v4778_v62, %v4216_v50  ;;  %v1259_v53 = vsel %vm400_vm1, %v907_v7, %v4215_v51  ;;  %v1287_v62 = vrot.slane %v4624_v32, %v4801_v3  ;;  %v4498_v7 = vld [vmem:[%s5123_s0] sm:$0xff]  ;;  %v1410_v50 = vsub.s32 7, %v4616_v30 }
 0x4c4   :  { %v4219_v49 = vpop.permute.xlu0 %4218 }
 0x4c5   :  { %v4221_v54 = vunpack.i.h.bf16 %v4219_v49  ;;  %v4220_v52 = vunpack.i.l.bf16 %v4219_v49  ;;  %v1405_v49 = vrot.slane %v4624_v32, %v1404_v46 }
 0x4c7   :  { %v1263_v59 = vsel %vm1261_vm4, %v1260_v56, %v4221_v54  ;;  %v1262_v60 = vsel %vm1261_vm4, %v1259_v53, %v4220_v52 }
 0x4cc   :  { %v4224_v55 = vpop.permute.xlu1 %4223 }
 0x4cd   :  { %v4226_v57 = vunpack.i.h.bf16 %v4224_v55  ;;  %v4225_v58 = vunpack.i.l.bf16 %v4224_v55  ;;  %v1411_v55 = vrot.slane %v4624_v32, %v1410_v50 }
 0x4cf   :  { %v1266_v61 = vsel %vm1264_vm5, %v1263_v59, %v4226_v57  ;;  %v1265_v2 = vsel %vm1264_vm5, %v1262_v60, %v4225_v58  ;;  %v4335_v59 = vld [vmem:[#allocation2 + $0x74] ss:$24 sps:$4 sm:$0xff]   ;;  %v4336_v60 = vld [vmem:[#allocation2 + $0x44] ss:$24 sps:$4 sm:$0xff]  }
 0x4d0   :  { %v1283_v63 = vpack.c.bf16 %v1266_v61, %v1265_v2  ;;  %v4337_v61 = vld [vmem:[#allocation2 + $0x14] ss:$24 sps:$4 sm:$0xff]   ;;  %v4836_v2 = vsub.s32 4, %v4616_v30 }
 0x4d2   :  { %3917 = vmatmul.mubr.bf16.vlgmr.msra.gmra.mxu0 %v1283_v63  ;;  %v1450_v63 = vrot.slane %v4624_v32, %v4836_v2 }
 0x4d3   :  { %3956 = vmatprep.mubr.msk.bf16.mxu0 %vm4552_vm0, %v4551_v1  ;;  %3941 = vmatpush3.bf16.msra.mxu0 %v4330_v37 }
 0x4d4   :  { %3942 = vmatprep.subr.bf16.mxu0 %v4551_v1 }
 0x4d7   :  { %3943 = vmatpush3.bf16.msra.mxu0 %v4331_v38  ;;  %v4344_v38 = vld [vmem:[#allocation2 + $0x2a4] ss:$24 sps:$4 sm:$0xff]  }
 0x4d8   :  { %3944 = vmatprep.subr.bf16.mxu0 %v4551_v1 }
 0x4db   :  { %3945 = vmatpush3.bf16.msra.mxu0 %v4332_v25  ;;  %v4342_v25 = vld [vmem:[#allocation2 + $0x2a0] ss:$24 sps:$4 sm:$0xff]  }
 0x4dc   :  { %3946 = vmatprep.subr.bf16.mxu0 %v4551_v1 }
 0x4df   :  { %3947 = vmatpush3.bf16.msra.mxu0 %v4333_v26  ;;  %v4345_v26 = vld [vmem:[#allocation2 + $0x2a8] ss:$24 sps:$4 sm:$0xff]  }
 0x4e0   :  { %3948 = vmatprep.subr.bf16.mxu0 %v4551_v1 }
 0x4e3   :  { %3949 = vmatpush3.bf16.msra.mxu0 %v4334_v39  ;;  %v4348_v39 = vld [vmem:[#allocation2 + $0x274] ss:$24 sps:$4 sm:$0xff]  }
 0x4e4   :  { %3950 = vmatprep.subr.bf16.mxu0 %v4551_v1 }
 0x4e7   :  { %3951 = vmatpush3.bf16.msra.mxu0 %v4335_v59 }
 0x4e8   :  { %3952 = vmatprep.subr.bf16.mxu0 %v4551_v1 }
 0x4eb   :  { %3953 = vmatpush3.bf16.msra.mxu0 %v4336_v60 }
 0x4ec   :  { %3954 = vmatprep.subr.bf16.mxu0 %v4551_v1 }
 0x4ef   :  { %3955 = vmatpush3.bf16.msra.mxu0 %v4337_v61 }
 0x4f0   :  { %3960 = vmatprep.subr.bf16.mxu0 %v4551_v1 }
 0x592   :  { %v1370_v4 = vpop.f32.mrf.mxu0 }
 0x593   :  { %v1371_v5 = vadd.f32 %v1370_v4, %v1287_v62 }
 0x594   :  { %v3918_v6 = vpop.f32.mrf.mxu0 }
 0x595   :  { %v1377_v8 = vadd.f32 %v4498_v7, %v1371_v5 }
 0x596   :  { %v1373_v9 = vpop.f32.mrf.mxu0 }
 0x597   :  { %v1374_v10 = vadd.f32 %v1373_v9, %v1287_v62  ;;  %1379 = vadd.xlane.f32.xlu0 %v1377_v8 }
 0x598   :  { %v3919_v11 = vpop.f32.mrf.mxu0 }
 0x599   :  { %v1378_v14 = vadd.f32 %v4499_v13, %v1374_v10  ;;  %v1545_v11 = vsub.s32 5, %v4616_v30 }
 0x59b   :  { %1381 = vadd.xlane.f32.xlu1 %v1378_v14  ;;  %v1546_v13 = vrot.slane %v4624_v32, %v1545_v11 }
 0x620   :  { %v1380_v16 = vpop.xlane.xlu0 %1379 }
 0x621   :  { %v1384_v17 = vmul.f32 0.0078125, %v1380_v16 }
 0x623   :  { %v1386_v18 = vsub.f32 %v1377_v8, %v1384_v17 }
 0x624   :  { %v1382_v19 = vpop.xlane.xlu1 %1381 }
 0x625   :  { %v1385_v20 = vmul.f32 0.0078125, %v1382_v19  ;;  %v1388_v21 = vmul.f32 %v1386_v18, %v1386_v18 }
 0x627   :  { %v1387_v22 = vsub.f32 %v1378_v14, %v1385_v20  ;;  %1390 = vadd.xlane.f32.xlu0 %v1388_v21 }
 0x629   :  { %v1389_v23 = vmul.f32 %v1387_v22, %v1387_v22 }
 0x62b   :  { %1392 = vadd.xlane.f32.xlu0 %v1389_v23  ;;  %v4340_v23 = vld [vmem:[#allocation2 + $0x2d4] ss:$24 sps:$4 sm:$0xff]  }
 0x62c   :  { %1837 = vmatprep.subr.bf16.mxu1 %v4340_v23 }
 0x6b0   :  { %v1391_v40 = vpop.xlane.xlu0 %1390 }
 0x6b1   :  { %v1394_v41 = vmul.f32 0.0078125, %v1391_v40  ;;  %v4346_v40 = vld [vmem:[#allocation2 + $0x270] ss:$24 sps:$4 sm:$0xff]  }
 0x6b3   :  { %v1396_v43 = vadd.f32 1e-05, %v1394_v41  ;;  %v4349_v41 = vld [vmem:[#allocation2 + $0x278] ss:$24 sps:$4 sm:$0xff]  }
 0x6b4   :  { %v1393_v44 = vpop.xlane.xlu0 %1392 }
 0x6b5   :  { %4434 = vrsqrt.f32 %v1396_v43  ;;  %v1395_v45 = vmul.f32 0.0078125, %v1393_v44  ;;  %v4350_v43 = vld [vmem:[#allocation2 + $0x240] ss:$24 sps:$4 sm:$0xff]   ;;  %v4352_v44 = vld [vmem:[#allocation2 + $0x244] ss:$24 sps:$4 sm:$0xff]  }
 0x6b7   :  { %v1397_v42 = vadd.f32 1e-05, %v1395_v45  ;;  %v4353_v45 = vld [vmem:[#allocation2 + $0x248] ss:$24 sps:$4 sm:$0xff]  }
 0x6b9   :  { %4436 = vrsqrt.f32 %v1397_v42  ;;  %v4356_v42 = vld [vmem:[#allocation2 + $0x214] ss:$24 sps:$4 sm:$0xff]  }
 0x6c2   :  { %v4435_v47 = vpop.eup %4434 }
 0x6c3   :  { %v1400_v48 = vmul.f32 %v4435_v47, %v1386_v18  ;;  %v4354_v47 = vld [vmem:[#allocation2 + $0x210] ss:$24 sps:$4 sm:$0xff]  }
 0x6c5   :  { %v1406_v52 = vmul.f32 %v1405_v49, %v1400_v48  ;;  %v4357_v48 = vld [vmem:[#allocation2 + $0x218] ss:$24 sps:$4 sm:$0xff]  }
 0x6c6   :  { %v4437_v51 = vpop.eup %4436 }
 0x6c7   :  { %v1401_v54 = vmul.f32 %v4437_v51, %v1387_v22  ;;  %v1412_v53 = vadd.f32 %v1411_v55, %v1406_v52  ;;  %v4338_v22 = vld [vmem:[#allocation2 + $0x2d0] ss:$24 sps:$4 sm:$0xff]   ;;  %v4358_v51 = vld [vmem:[#allocation2 + $0x1e0] ss:$24 sps:$4 sm:$0xff]   ;;  %v4364_v52 = vld [vmem:[#allocation2 + $0x1b4] ss:$24 sps:$4 sm:$0xff]  }
 0x6c9   :  { %v1407_v56 = vmul.f32 %v1405_v49, %v1401_v54  ;;  %v4360_v49 = vld [vmem:[#allocation2 + $0x1e4] ss:$24 sps:$4 sm:$0xff]   ;;  %v4361_v54 = vld [vmem:[#allocation2 + $0x1e8] ss:$24 sps:$4 sm:$0xff]  }
 0x6cb   :  { %v1413_v57 = vadd.f32 %v1411_v55, %v1407_v56  ;;  %v4362_v55 = vld [vmem:[#allocation2 + $0x1b0] ss:$24 sps:$4 sm:$0xff]  }
 0x6cc   :  { %v4365_v56 = vld [vmem:[#allocation2 + $0x1b8] ss:$24 sps:$4 sm:$0xff]  }
 0x6cd   :  { %v1446_v58 = vpack.c.bf16 %v1413_v57, %v1412_v53 }
 0x6cf   :  { %3937 = vmatmul.mubr.bf16.vlgmr.msra.gmra.mxu1 %v1446_v58  ;;  %v4369_v58 = vld [vmem:[#allocation2 + $0x188] ss:$24 sps:$4 sm:$0xff]  }
 0x6d0   :  { %1869 = vmatprep.mubr.bf16.mxu1 %v4550_v0  ;;  %1838 = vmatpush1.bf16.msra.mxu1 %v4338_v22 }
 0x6d1   :  { %1839 = vmatprep.subr.bf16.mxu1 %v4344_v38 }
 0x6d4   :  { %1840 = vmatpush1.bf16.msra.mxu1 %v4342_v25 }
 0x6d5   :  { %1841 = vmatprep.subr.bf16.mxu1 %v4348_v39 }
 0x6d8   :  { %1842 = vmatpush1.bf16.msra.mxu1 %v4346_v40 }
 0x6d9   :  { %1843 = vmatprep.subr.bf16.mxu1 %v4352_v44 }
 0x6dc   :  { %1844 = vmatpush1.bf16.msra.mxu1 %v4350_v43 }
 0x6dd   :  { %1845 = vmatprep.subr.bf16.mxu1 %v4356_v42 }
 0x6e0   :  { %1846 = vmatpush1.bf16.msra.mxu1 %v4354_v47 }
 0x6e1   :  { %1847 = vmatprep.subr.bf16.mxu1 %v4360_v49 }
 0x6e4   :  { %1848 = vmatpush1.bf16.msra.mxu1 %v4358_v51 }
 0x6e5   :  { %1849 = vmatprep.subr.bf16.mxu1 %v4364_v52 }
 0x6e8   :  { %1850 = vmatpush1.bf16.msra.mxu1 %v4362_v55 }
 0x78f   :  { %v1533_v62 = vpop.f32.mrf.mxu1 }
 0x790   :  { %v1534_v4 = vadd.f32 %v1533_v62, %v1450_v63 }
 0x791   :  { %v3938_v0 = vpop.f32.mrf.mxu1 }
 0x792   :  { %v1540_v8 = vmax.f32 %v1534_v4, 0.0  ;;  %v52_v4 = vld [vmem:[%s5125_s2 + $0x8] sm:$0x3] }
 0x793   :  { %v1536_v5 = vpop.f32.mrf.mxu1 }
 0x794   :  { %v1537_v6 = vadd.f32 %v1536_v5, %v1450_v63 }
 0x795   :  { %v3939_v7 = vpop.f32.mrf.mxu1 }
 0x796   :  { %v1541_v9 = vmax.f32 %v1537_v6, 0.0  ;;  %v1663_v7 = vrot.slane %v52_v4, %v4629_v35 }
 0x798   :  { %v1542_v10 = vpack.c.bf16 %v1541_v9, %v1540_v8 }
 0x79a   :  { %3957 = vmatmul.mubr.bf16.vlgmr.msra.gmra.mxu0 %v1542_v10 }
 0x79b   :  { %3976 = vmatprep.mubr.msk.bf16.mxu0 %vm4552_vm0, %v4551_v1  ;;  %3961 = vmatpush3.bf16.msra.mxu0 %v4341_v24 }
 0x79c   :  { %3962 = vmatprep.subr.bf16.mxu0 %v4551_v1 }
 0x79f   :  { %3963 = vmatpush3.bf16.msra.mxu0 %v4345_v26 }
 0x7a0   :  { %3964 = vmatprep.subr.bf16.mxu0 %v4551_v1 }
 0x7a3   :  { %3965 = vmatpush3.bf16.msra.mxu0 %v4349_v41 }
 0x7a4   :  { %3966 = vmatprep.subr.bf16.mxu0 %v4551_v1 }
 0x7a7   :  { %3967 = vmatpush3.bf16.msra.mxu0 %v4353_v45 }
 0x7a8   :  { %3968 = vmatprep.subr.bf16.mxu0 %v4551_v1 }
 0x7ab   :  { %3969 = vmatpush3.bf16.msra.mxu0 %v4357_v48 }
 0x7ac   :  { %3970 = vmatprep.subr.bf16.mxu0 %v4551_v1 }
 0x7af   :  { %3971 = vmatpush3.bf16.msra.mxu0 %v4361_v54 }
 0x7b0   :  { %3972 = vmatprep.subr.bf16.mxu0 %v4551_v1 }
 0x7b3   :  { %3973 = vmatpush3.bf16.msra.mxu0 %v4365_v56 }
 0x7b4   :  { %3974 = vmatprep.subr.bf16.mxu0 %v4551_v1 }
 0x7b7   :  { %3975 = vmatpush3.bf16.msra.mxu0 %v4369_v58 }
 0x7b8   :  { %4004 = vmatprep.subr.bf16.mxu0 %v4551_v1 }
 0x85a   :  { %v1629_v14 = vpop.f32.mrf.mxu0 }
 0x85b   :  { %v1630_v15 = vadd.f32 %v1629_v14, %v1546_v13 }
 0x85c   :  { %v3958_v16 = vpop.f32.mrf.mxu0 }
 0x85d   :  { %v1636_v17 = vadd.f32 %v1630_v15, %v1412_v53  ;;  %v4368_v53 = vld [vmem:[#allocation2 + $0x184] ss:$24 sps:$4 sm:$0xff]  }
 0x85e   :  { %v1632_v18 = vpop.f32.mrf.mxu0  ;;  %1851 = vmatprep.subr.bf16.mxu1 %v4368_v53 }
 0x85f   :  { %v1633_v19 = vadd.f32 %v1632_v18, %v1546_v13  ;;  %1638 = vadd.xlane.f32.xlu1 %v1636_v17  ;;  %v1669_v13 = vrot.slane %v52_v4, %v4619_v31  ;;  %v4883_v18 = vld [vmem:[%s5125_s2 + $0x10] sm:$0xff] }
 0x860   :  { %v3959_v20 = vpop.f32.mrf.mxu0  ;;  %v1936_v22 = vrot.slane %v4883_v18, %v4654_v12 }
 0x861   :  { %v1637_v21 = vadd.f32 %v1633_v19, %v1413_v57  ;;  %v4366_v57 = vld [vmem:[#allocation2 + $0x180] ss:$24 sps:$4 sm:$0xff]   ;;  %v1930_v19 = vrot.slane %v4883_v18, %v4619_v31 }
 0x862   :  { %1852 = vmatpush1.bf16.msra.mxu1 %v4366_v57 }
 0x863   :  { %1640 = vadd.xlane.f32.xlu0 %v1637_v21  ;;  %3980 = vmatprep.subr.bf16.mxu1 %v4551_v1 }
 0x8e8   :  { %v1639_v27 = vpop.xlane.xlu1 %1638 }
 0x8e9   :  { %v1642_v32 = vmul.f32 0.0078125, %v1639_v27  ;;  %v1924_v27 = vrot.slane %v4883_v18, %v4629_v35 }
 0x8eb   :  { %v4847_v28 = vsub.f32 %v1636_v17, %v1642_v32 }
 0x8ec   :  { %v1641_v29 = vpop.xlane.xlu0 %1640 }
 0x8ed   :  { %v1643_v33 = vmul.f32 0.0078125, %v1641_v29  ;;  %v1646_v34 = vmul.f32 %v4847_v28, %v4847_v28 }
 0x8ef   :  { %v4851_v36 = vsub.f32 %v1637_v21, %v1643_v33  ;;  %1648 = vadd.xlane.f32.xlu1 %v1646_v34 }
 0x8f1   :  { %v1647_v37 = vmul.f32 %v4851_v36, %v4851_v36 }
 0x8f3   :  { %1650 = vadd.xlane.f32.xlu0 %v1647_v37 }
 0x978   :  { %v1649_v59 = vpop.xlane.xlu1 %1648 }
 0x979   :  { %v1652_v60 = vmul.f32 0.0078125, %v1649_v59 }
 0x97b   :  { %v1654_v61 = vadd.f32 1e-05, %v1652_v60 }
 0x97c   :  { %v1651_v63 = vpop.xlane.xlu0 %1650 }
 0x97d   :  { %4438 = vrsqrt.f32 %v1654_v61  ;;  %v1653_v62 = vmul.f32 0.0078125, %v1651_v63 }
 0x97f   :  { %v1655_v0 = vadd.f32 1e-05, %v1653_v62 }
 0x981   :  { %4440 = vrsqrt.f32 %v1655_v0 }
 0x98a   :  { %v4439_v5 = vpop.eup %4438 }
 0x98b   :  { %v1658_v6 = vmul.f32 %v4439_v5, %v4847_v28 }
 0x98d   :  { %v1664_v10 = vmul.f32 %v1663_v7, %v1658_v6 }
 0x98e   :  { %v4441_v8 = vpop.eup %4440 }
 0x98f   :  { %v1659_v9 = vmul.f32 %v4441_v8, %v4851_v36  ;;  %v4870_v15 = vadd.f32 %v1669_v13, %v1664_v10 }
 0x991   :  { %v1665_v14 = vmul.f32 %v1663_v7, %v1659_v9 }
 0x993   :  { %v4872_v16 = vadd.f32 %v1669_v13, %v1665_v14 }
 0x995   :  { %v1708_v17 = vpack.c.bf16 %v4872_v16, %v4870_v15 }
 0x997   :  { %1870 = vmatmul.mubr.bf16.vlgmr.msra.gmra.mxu1 %v1708_v17  ;;  %3977 = vmatmul.mubr.bf16.vlgmr.msra.gmra.mxu0 %v1708_v17 }
 0x998   :  { %3982 = vmatprep.mubr.msk.bf16.mxu1 %vm4552_vm0, %v4551_v1  ;;  %4006 = vmatprep.mubr.msk.bf16.mxu0 %vm4552_vm0, %v4551_v1 }
 0xa57   :  { %v1871_v20 = vpop.f32.mrf.mxu1  ;;  %v1914_v21 = vpop.f32.mrf.mxu0 }
 0xa58   :  { %v4894_v36 = vadd.f32 %v1936_v22, %v1914_v21  ;;  %v1925_v25 = vadd.f32 %v1924_v27, %v1871_v20 }
 0xa59   :  { %v1873_v23 = vpop.f32.mrf.mxu1  ;;  %v3978_v24 = vpop.f32.mrf.mxu0 }
 0xa5a   :  { %v1931_v32 = vadd.f32 %v1930_v19, %v1873_v23  ;;  %v1959_v42 = vpack.c.bf16 %v1925_v25, %v1925_v25 }
 0xa5b   :  { %v1875_v28 = vpop.f32.mrf.mxu1  ;;  %v1917_v29 = vpop.f32.mrf.mxu0 }
 0xa5c   :  { %v4891_v33 = vadd.f32 %v1936_v22, %v1917_v29  ;;  %1969 = vrot.lane.b32.xlu1 %v1931_v32, %s4553_s11  ;;  %v1987_v34 = vpack.c.bf16 %v1931_v32, %v1931_v32  ;;  %v1926_v26 = vadd.f32 %v1924_v27, %v1875_v28 }
 0xa5d   :  { %v1877_v37 = vpop.f32.mrf.mxu1  ;;  %v3979_v38 = vpop.f32.mrf.mxu0 }
 0xa5e   :  { %v1932_v39 = vadd.f32 %v1930_v19, %v1877_v37  ;;  %v2027_v40 = vsel %vm400_vm1, %v1987_v34, 0  ;;  %v4899_v41 = vpack.i.bf16 %v4891_v33, %v4894_v36  ;;  %v4237_v47 = vpack.i.bf16 %v1926_v26, %v1925_v25 }
 0xa5f   :  { %3981 = vmatpush3.bf16.xpose.msra.mxu1 %v2027_v40  ;;  %v1960_v49 = vpack.c.bf16 %v1926_v26, %v1926_v26 }
 0xa60   :  { %1943 = vrot.lane.b32.xlu1 %v1926_v26, %s4553_s11  ;;  %v4227_v43 = vpack.i.bf16 %v1932_v39, %v1925_v25  ;;  %3986 = vmatprep.subr.bf16.mxu1 %v4551_v1  ;;  %v4232_v44 = vpack.i.bf16 %v1932_v39, %v1931_v32  ;;  %v1988_v45 = vpack.c.bf16 %v1932_v39, %v1932_v39 }
 0xa61   :  { %v2015_v32 = vpack.c.bf16 %v4894_v36, %v4894_v36  ;;  %v2016_v36 = vpack.c.bf16 %v4891_v33, %v4891_v33 }
 0xa62   :  { %4228 = vrot.lane.b32.xlu0 %v4227_v43, %s4553_s11  ;;  %v2073_v48 = vsel %vm400_vm1, %v1988_v45, 0 }
 0xa63   :  { %v2491_v37 = vsel %vm869_vm2, %v2015_v32, 0  ;;  %v2537_v25 = vsel %vm869_vm2, %v2016_v36, 0 }
 0xa64   :  { %4233 = vrot.lane.b32.xlu1 %v4232_v44, %s4548_s28 }
 0xa66   :  { %3983 = vmatmul.mubr.msk.bf16.vlgmr.msra.gmra.mxu1 %vm400_vm1, %v1959_v42  ;;  %4238 = vrot.lane.b32.xlu0 %v4237_v47, %s4548_s28 }
 0xa67   :  { %3987 = vmatpush3.bf16.xpose.msra.mxu1 %v2073_v48  ;;  %3988 = vmatprep.mubr.msk.bf16.mxu1 %vm4552_vm0, %v4551_v1 }
 0xa68   :  { %4243 = vrot.lane.b32.xlu1 %v4232_v44, %s4554_s12  ;;  %3992 = vmatprep.subr.bf16.mxu1 %v4551_v1 }
 0xa6a   :  { %4248 = vrot.lane.b32.xlu0 %v4237_v47, %s4554_s12 }
 0xa6e   :  { %3989 = vmatmul.mubr.msk.bf16.vlgmr.msra.gmra.mxu1 %vm400_vm1, %v1960_v49 }
 0xa6f   :  { %3994 = vmatprep.mubr.msk.bf16.mxu1 %vm4552_vm0, %v4551_v1 }
 0xace   :  { %v1970_v51 = vpop.permute.xlu1 %1969 }
 0xacf   :  { %v1989_v54 = vpack.c.bf16 %v1970_v51, %v1970_v51 }
 0xad1   :  { %v2119_v52 = vsel %vm400_vm1, %v1989_v54, 0 }
 0xad2   :  { %v1944_v55 = vpop.permute.xlu1 %1943  ;;  %3993 = vmatpush3.bf16.xpose.msra.mxu1 %v2119_v52 }
 0xad3   :  { %3998 = vmatprep.subr.bf16.mxu1 %v4551_v1  ;;  %v1962_v10 = vpack.c.bf16 %v1944_v55, %v1944_v55 }
 0xad4   :  { %v4229_v56 = vpop.permute.xlu0 %4228 }
 0xad5   :  { %v4231_v53 = vunpack.i.h.bf16 %v4229_v56  ;;  %v4230_v57 = vunpack.i.l.bf16 %v4229_v56 }
 0xad6   :  { %v4234_v58 = vpop.permute.xlu1 %4233 }
 0xad7   :  { %v1990_v59 = vpack.c.bf16 %v4231_v53, %v4231_v53  ;;  %v1961_v60 = vpack.c.bf16 %v4230_v57, %v4230_v57  ;;  %v4235_v61 = vunpack.i.l.bf16 %v4234_v58  ;;  %v4236_v62 = vunpack.i.h.bf16 %v4234_v58 }
 0xad8   :  { %v4239_v5 = vpop.permute.xlu0 %4238 }
 0xad9   :  { %v1991_v63 = vpack.c.bf16 %v4235_v61, %v4235_v61  ;;  %3995 = vmatmul.mubr.msk.bf16.vlgmr.msra.gmra.mxu1 %vm400_vm1, %v1961_v60  ;;  %v2165_v4 = vsel %vm400_vm1, %v1990_v59, 0  ;;  %v1992_v8 = vpack.c.bf16 %v4236_v62, %v4236_v62  ;;  %v4240_v9 = vunpack.i.l.bf16 %v4239_v5 }
 0xada   :  { %v4244_v0 = vpop.permute.xlu1 %4243  ;;  %4000 = vmatprep.mubr.msk.bf16.mxu1 %vm4552_vm0, %v4551_v1  ;;  %3999 = vmatpush3.bf16.xpose.msra.mxu1 %v2165_v4  ;;  %v4241_v21 = vunpack.i.h.bf16 %v4239_v5 }
 0xadb   :  { %v4245_v6 = vunpack.i.l.bf16 %v4244_v0  ;;  %v2211_v7 = vsel %vm400_vm1, %v1991_v63, 0  ;;  %4010 = vmatprep.subr.bf16.mxu1 %v4551_v1  ;;  %v1963_v14 = vpack.c.bf16 %v4240_v9, %v4240_v9  ;;  %v4246_v17 = vunpack.i.h.bf16 %v4244_v0 }
 0xadc   :  { %4005 = vmatpush3.bf16.xpose.msra.mxu0 %v2211_v7  ;;  %v2257_v19 = vsel %vm400_vm1, %v1992_v8, 0  ;;  %v4249_v20 = vpop.permute.xlu0 %4248  ;;  %v1964_v27 = vpack.c.bf16 %v4241_v21, %v4241_v21 }
 0xadd   :  { %4016 = vmatprep.subr.bf16.mxu0 %v4551_v1  ;;  %v1993_v13 = vpack.c.bf16 %v4245_v6, %v4245_v6  ;;  %v1994_v23 = vpack.c.bf16 %v4246_v17, %v4246_v17  ;;  %v4250_v24 = vunpack.i.l.bf16 %v4249_v20  ;;  %v4251_v34 = vunpack.i.h.bf16 %v4249_v20 }
 0xadf   :  { %v2303_v22 = vsel %vm400_vm1, %v1993_v13, 0  ;;  %v1965_v28 = vpack.c.bf16 %v4250_v24, %v4250_v24  ;;  %v2349_v29 = vsel %vm400_vm1, %v1994_v23, 0  ;;  %v1966_v38 = vpack.c.bf16 %v4251_v34, %v4251_v34 }
 0xae1   :  { %4001 = vmatmul.mubr.msk.bf16.vlgmr.msra.gmra.mxu1 %vm400_vm1, %v1962_v10 }
 0xae2   :  { %4011 = vmatpush3.bf16.xpose.msra.mxu1 %v2257_v19  ;;  %4012 = vmatprep.mubr.msk.bf16.mxu1 %vm4552_vm0, %v4551_v1 }
 0xae3   :  { %4007 = vmatmul.mubr.msk.bf16.vlgmr.msra.gmra.mxu0 %vm400_vm1, %v1963_v14  ;;  %4022 = vmatprep.subr.bf16.mxu1 %v4551_v1 }
 0xae4   :  { %4017 = vmatpush3.bf16.xpose.msra.mxu0 %v2303_v22  ;;  %4018 = vmatprep.mubr.msk.bf16.mxu0 %vm4552_vm0, %v4551_v1 }
 0xae5   :  { %4028 = vmatprep.subr.bf16.mxu0 %v4551_v1 }
 0xae9   :  { %4013 = vmatmul.mubr.msk.bf16.vlgmr.msra.gmra.mxu1 %vm400_vm1, %v1964_v27 }
 0xaea   :  { %4023 = vmatpush3.bf16.xpose.msra.mxu1 %v2349_v29  ;;  %4024 = vmatprep.mubr.msk.bf16.mxu1 %vm4552_vm0, %v4551_v1 }
 0xaeb   :  { %4019 = vmatmul.mubr.msk.bf16.vlgmr.msra.gmra.mxu0 %vm400_vm1, %v1965_v28  ;;  %4034 = vmatprep.subr.bf16.mxu1 %v4551_v1 }
 0xaec   :  { %4029 = vmatpush3.bf16.msra.mxu0 %v2491_v37  ;;  %4030 = vmatprep.mubr.msk.bf16.mxu0 %vm4552_vm0, %v4551_v1 }
 0xaed   :  { %4040 = vmatprep.subr.bf16.mxu0 %v4551_v1 }
 0xaf1   :  { %4025 = vmatmul.mubr.msk.bf16.vlgmr.msra.gmra.mxu1 %vm400_vm1, %v1966_v38 }
 0xaf2   :  { %4035 = vmatpush3.bf16.msra.mxu1 %v2537_v25  ;;  %4036 = vmatprep.mubr.msk.bf16.mxu1 %vm4552_vm0, %v4551_v1 }
 0xaf3   :  { %4046 = vmatprep.subr.bf16.mxu1 %v4551_v1 }
 0xb26   :  { %v2063_v26 = vpop.f32.mrf.mxu1 }
 0xb27   :  { %v2391_v39 = vsel %vm769_vm3, %v2063_v26, -inf }
 0xb28   :  { %v3984_v40 = vpop.f32.mrf.mxu1  ;;  %2392 = vmax.xlane.f32.xlu1 %v2391_v39 }
 0xb2a   :  { %v2066_v43 = vpop.f32.mrf.mxu1 }
 0xb2c   :  { %v3985_v33 = vpop.f32.mrf.mxu1 }
 0xb2e   :  { %v2109_v44 = vpop.f32.mrf.mxu1 }
 0xb2f   :  { %v2394_v45 = vsel %vm769_vm3, %v2109_v44, -inf }
 0xb30   :  { %2395 = vmax.xlane.f32.xlu0 %v2394_v45  ;;  %v3990_v42 = vpop.f32.mrf.mxu1 }
 0xb32   :  { %v2112_v47 = vpop.f32.mrf.mxu1 }
 0xb34   :  { %v3991_v48 = vpop.f32.mrf.mxu1 }
 0xb99   :  { %v2155_v49 = vpop.f32.mrf.mxu1 }
 0xb9a   :  { %v2397_v51 = vsel %vm769_vm3, %v2155_v49, -inf }
 0xb9b   :  { %2398 = vmax.xlane.f32.xlu0 %v2397_v51  ;;  %v3996_v54 = vpop.f32.mrf.mxu1 }
 0xb9d   :  { %v2158_v52 = vpop.f32.mrf.mxu1 }
 0xb9f   :  { %v3997_v55 = vpop.f32.mrf.mxu1 }
 0xba1   :  { %v2201_v56 = vpop.f32.mrf.mxu1 }
 0xba2   :  { %v2400_v53 = vsel %vm769_vm3, %v2201_v56, -inf }
 0xba3   :  { %v2247_v57 = vpop.f32.mrf.mxu0  ;;  %2401 = vmax.xlane.f32.xlu1 %v2400_v53  ;;  %v4002_v58 = vpop.f32.mrf.mxu1 }
 0xba4   :  { %v2403_v59 = vsel %vm769_vm3, %v2247_v57, -inf }
 0xba5   :  { %v4008_v60 = vpop.f32.mrf.mxu0  ;;  %2404 = vmax.xlane.f32.xlu0 %v2403_v59  ;;  %v2204_v61 = vpop.f32.mrf.mxu1 }
 0xba7   :  { %v4003_v63 = vpop.f32.mrf.mxu1  ;;  %v2250_v62 = vpop.f32.mrf.mxu0 }
 0xba9   :  { %v4009_v0 = vpop.f32.mrf.mxu0  ;;  %v4959_v4 = vpop.f32.mrf.mxu1 }
 0xbaa   :  { %v2406_v5 = vsel %vm769_vm3, %v4959_v4, -inf }
 0xbab   :  { %v2339_v6 = vpop.f32.mrf.mxu0  ;;  %2407 = vmax.xlane.f32.xlu1 %v2406_v5  ;;  %v4014_v7 = vpop.f32.mrf.mxu1 }
 0xbac   :  { %v2409_v8 = vsel %vm769_vm3, %v2339_v6, -inf }
 0xbad   :  { %v4020_v9 = vpop.f32.mrf.mxu0  ;;  %2410 = vmax.xlane.f32.xlu0 %v2409_v8  ;;  %v2296_v10 = vpop.f32.mrf.mxu1 }
 0xbaf   :  { %v4015_v13 = vpop.f32.mrf.mxu1  ;;  %v2342_v14 = vpop.f32.mrf.mxu0 }
 0xbb1   :  { %v2393_v17 = vpop.xlane.xlu1 %2392  ;;  %v4021_v20 = vpop.f32.mrf.mxu0 }
 0xbb2   :  { %v2415_v19 = vsub.f32 %v2063_v26, %v2393_v17  ;;  %v4964_v21 = vpop.f32.mrf.mxu1 }
 0xbb3   :  { %v2412_v22 = vsel %vm769_vm3, %v4964_v21, -inf }
 0xbb4   :  { %v2423_v23 = vmul.f32 1.442695, %v2415_v19  ;;  %2413 = vmax.xlane.f32.xlu1 %v2412_v22  ;;  %v4026_v24 = vpop.f32.mrf.mxu1 }
 0xbb6   :  { %4442 = vpow2.f32 %v2423_v23  ;;  %v2388_v27 = vpop.f32.mrf.mxu1 }
 0xbb8   :  { %v4027_v32 = vpop.f32.mrf.mxu1 }
 0xbb9   :  { %v2396_v28 = vpop.xlane.xlu0 %2395 }
 0xbba   :  { %v2416_v29 = vsub.f32 %v2109_v44, %v2396_v28 }
 0xbbc   :  { %v2425_v34 = vmul.f32 1.442695, %v2416_v29 }
 0xbbe   :  { %4444 = vpow2.f32 %v2425_v34 }
 0xbc3   :  { %v4443_v37 = vpop.eup %4442 }
 0xbc4   :  { %v2439_v36 = vsel %vm769_vm3, %v4443_v37, 0.0 }
 0xbc5   :  { %2440 = vadd.xlane.f32.xlu0 %v2439_v36 }
 0xbcb   :  { %v4445_v38 = vpop.eup %4444 }
 0xbcc   :  { %v2442_v25 = vsel %vm769_vm3, %v4445_v38, 0.0 }
 0xbcd   :  { %2443 = vadd.xlane.f32.xlu1 %v2442_v25 }
 0xc24   :  { %v2399_v26 = vpop.xlane.xlu0 %2398 }
 0xc25   :  { %v2417_v39 = vsub.f32 %v2155_v49, %v2399_v26 }
 0xc27   :  { %v2427_v40 = vmul.f32 1.442695, %v2417_v39 }
 0xc29   :  { %4446 = vpow2.f32 %v2427_v40 }
 0xc2c   :  { %v2402_v43 = vpop.xlane.xlu1 %2401 }
 0xc2d   :  { %v2418_v33 = vsub.f32 %v2201_v56, %v2402_v43 }
 0xc2e   :  { %v2405_v45 = vpop.xlane.xlu0 %2404 }
 0xc2f   :  { %v2429_v42 = vmul.f32 1.442695, %v2418_v33  ;;  %v2419_v47 = vsub.f32 %v2247_v57, %v2405_v45 }
 0xc31   :  { %4448 = vpow2.f32 %v2429_v42  ;;  %v2431_v44 = vmul.f32 1.442695, %v2419_v47 }
 0xc33   :  { %4450 = vpow2.f32 %v2431_v44 }
 0xc34   :  { %v2408_v60 = vpop.xlane.xlu1 %2407 }
 0xc35   :  { %v2420_v5 = vsub.f32 %v4959_v4, %v2408_v60 }
 0xc36   :  { %v4970_v48 = vpop.eup %4446  ;;  %v2411_v51 = vpop.xlane.xlu0 %2410 }
 0xc37   :  { %v2445_v54 = vsel %vm769_vm3, %v4970_v48, 0.0  ;;  %v2421_v52 = vsub.f32 %v2339_v6, %v2411_v51  ;;  %v2433_v8 = vmul.f32 1.442695, %v2420_v5 }
 0xc38   :  { %2446 = vadd.xlane.f32.xlu0 %v2445_v54 }
 0xc39   :  { %v2435_v55 = vmul.f32 1.442695, %v2421_v52 }
 0xc3b   :  { %4452 = vpow2.f32 %v2435_v55 }
 0xc3d   :  { %v2414_v63 = vpop.xlane.xlu1 %2413 }
 0xc3e   :  { %v4449_v49 = vpop.eup %4448  ;;  %v2422_v9 = vsub.f32 %v4964_v21, %v2414_v63 }
 0xc3f   :  { %v2448_v53 = vsel %vm769_vm3, %v4449_v49, 0.0 }
 0xc40   :  { %v4975_v56 = vpop.eup %4450  ;;  %2449 = vadd.xlane.f32.xlu1 %v2448_v53  ;;  %v2437_v13 = vmul.f32 1.442695, %v2422_v9 }
 0xc41   :  { %v2451_v57 = vsel %vm769_vm3, %v4975_v56, 0.0 }
 0xc42   :  { %2452 = vadd.xlane.f32.xlu0 %v2451_v57 }
 0xc48   :  { %v4979_v58 = vpop.eup %4452 }
 0xc49   :  { %v2457_v59 = vsel %vm769_vm3, %v4979_v58, 0.0 }
 0xc4a   :  { %2458 = vadd.xlane.f32.xlu0 %v2457_v59 }
 0xc4e   :  { %v2441_v61 = vpop.xlane.xlu0 %2440 }
 0xc4f   :  { %4454 = vrcp.f32 %v2441_v61 }
 0xc51   :  { %4258 = vrot.lane.b32.xlu1 %v4899_v41, %s4548_s28 }
 0xc56   :  { %v2444_v62 = vpop.xlane.xlu1 %2443 }
 0xc57   :  { %4456 = vrcp.f32 %v2444_v62 }
 0xc58   :  { %4458 = vpow2.f32 %v2433_v8 }
 0xc59   :  { %4460 = vpow2.f32 %v2437_v13 }
 0xc5c   :  { %v4455_v0 = vpop.eup %4454 }
 0xc5d   :  { %v2471_v6 = vmul.f32 %v4455_v0, %v4443_v37 }
 0xc5f   :  { %v2479_v7 = vpack.c.bf16 %v2471_v6, %v2471_v6 }
 0xc60   :  { %4253 = vrot.lane.b32.xlu0 %v4899_v41, %s4553_s11 }
 0xc61   :  { %4031 = vmatmul.mubr.msk.bf16.vlgmr.msra.gmra.mxu0 %vm769_vm3, %v2479_v7 }
 0xc62   :  { %4042 = vmatprep.mubr.msk.bf16.mxu0 %vm4552_vm0, %v4551_v1 }
 0xc64   :  { %v4457_v10 = vpop.eup %4456 }
 0xc65   :  { %v2472_v14 = vmul.f32 %v4457_v10, %v4445_v38  ;;  %v4995_v4 = vpop.eup %4458 }
 0xc66   :  { %v2454_v19 = vsel %vm769_vm3, %v4995_v4, 0.0  ;;  %v4999_v20 = vpop.eup %4460 }
 0xc67   :  { %v2480_v17 = vpack.c.bf16 %v2472_v14, %v2472_v14  ;;  %v2460_v21 = vsel %vm769_vm3, %v4999_v20, 0.0 }
 0xc69   :  { %4037 = vmatmul.mubr.msk.bf16.vlgmr.msra.gmra.mxu1 %vm769_vm3, %v2480_v17 }
 0xc6a   :  { %4048 = vmatprep.mubr.msk.bf16.mxu1 %vm4552_vm0, %v4551_v1 }
 0xc75   :  { %2455 = vadd.xlane.f32.xlu1 %v2454_v19 }
 0xc79   :  { %2461 = vadd.xlane.f32.xlu1 %v2460_v21 }
 0xc8a   :  { %4263 = vrot.lane.b32.xlu1 %v4899_v41, %s4554_s12 }
 0xcc1   :  { %v2447_v22 = vpop.xlane.xlu0 %2446 }
 0xcc2   :  { %4462 = vrcp.f32 %v2447_v22 }
 0xcc9   :  { %v2450_v23 = vpop.xlane.xlu1 %2449 }
 0xcca   :  { %4464 = vrcp.f32 %v2450_v23 }
 0xccb   :  { %v2453_v24 = vpop.xlane.xlu0 %2452 }
 0xccc   :  { %4466 = vrcp.f32 %v2453_v24 }
 0xccd   :  { %v4259_v32 = vpop.permute.xlu1 %4258 }
 0xcce   :  { %v4261_v37 = vunpack.i.h.bf16 %v4259_v32  ;;  %v4260_v36 = vunpack.i.l.bf16 %v4259_v32  ;;  %v4372_v32 = vld [vmem:[#allocation2 + $0x27c] ss:$24 sps:$4 sm:$0xff]  }
 0xccf   :  { %v4463_v28 = vpop.eup %4462 }
 0xcd0   :  { %v2473_v40 = vmul.f32 %v4463_v28, %v4970_v48  ;;  %v2020_v43 = vpack.c.bf16 %v4261_v37, %v4261_v37  ;;  %v2019_v33 = vpack.c.bf16 %v4260_v36, %v4260_v36 }
 0xcd2   :  { %v2481_v47 = vpack.c.bf16 %v2473_v40, %v2473_v40  ;;  %v2675_v48 = vsel %vm869_vm2, %v2019_v33, 0  ;;  %v2721_v54 = vsel %vm869_vm2, %v2020_v43, 0 }
 0xcd3   :  { %v2459_v27 = vpop.xlane.xlu0 %2458 }
 0xcd4   :  { %4468 = vrcp.f32 %v2459_v27  ;;  %v4370_v27 = vld [vmem:[#allocation2 + $0x2dc] ss:$24 sps:$4 sm:$0xff]  }
 0xcd7   :  { %v4465_v29 = vpop.eup %4464  ;;  %v4254_v34 = vpop.permute.xlu0 %4253 }
 0xcd8   :  { %v4256_v38 = vunpack.i.h.bf16 %v4254_v34  ;;  %v4255_v25 = vunpack.i.l.bf16 %v4254_v34  ;;  %v2474_v41 = vmul.f32 %v4465_v29, %v4449_v49 }
 0xcd9   :  { %v4467_v51 = vpop.eup %4466 }
 0xcda   :  { %v2018_v26 = vpack.c.bf16 %v4256_v38, %v4256_v38  ;;  %v2017_v39 = vpack.c.bf16 %v4255_v25, %v4255_v25  ;;  %v2482_v44 = vpack.c.bf16 %v2474_v41, %v2474_v41  ;;  %v2475_v52 = vmul.f32 %v4467_v51, %v4975_v56  ;;  %v4373_v38 = vld [vmem:[#allocation2 + $0x24c] ss:$24 sps:$4 sm:$0xff]   ;;  %v4374_v41 = vld [vmem:[#allocation2 + $0x21c] ss:$24 sps:$4 sm:$0xff]  }
 0xcdc   :  { %v2583_v45 = vsel %vm869_vm2, %v2017_v39, 0  ;;  %v2629_v42 = vsel %vm869_vm2, %v2018_v26, 0  ;;  %v2483_v55 = vpack.c.bf16 %v2475_v52, %v2475_v52  ;;  %v4377_v52 = vld [vmem:[#allocation2 + $0x18c] ss:$24 sps:$4 sm:$0xff]  }
 0xcdd   :  { %4041 = vmatpush3.bf16.msra.mxu0 %v2583_v45  ;;  %4047 = vmatpush3.bf16.msra.mxu1 %v2629_v42 }
 0xcde   :  { %4052 = vmatprep.subr.bf16.mxu0 %v4551_v1  ;;  %4058 = vmatprep.subr.bf16.mxu1 %v4551_v1 }
 0xce0   :  { %4043 = vmatmul.mubr.msk.bf16.vlgmr.msra.gmra.mxu0 %vm769_vm3, %v2481_v47  ;;  %4049 = vmatmul.mubr.msk.bf16.vlgmr.msra.gmra.mxu1 %vm769_vm3, %v2482_v44  ;;  %v4375_v47 = vld [vmem:[#allocation2 + $0x1ec] ss:$24 sps:$4 sm:$0xff]   ;;  %v4376_v44 = vld [vmem:[#allocation2 + $0x1bc] ss:$24 sps:$4 sm:$0xff]  }
 0xce1   :  { %4053 = vmatpush3.bf16.msra.mxu0 %v2675_v48  ;;  %4059 = vmatpush3.bf16.msra.mxu1 %v2721_v54  ;;  %v4469_v57 = vpop.eup %4468 }
 0xce2   :  { %4054 = vmatprep.mubr.msk.bf16.mxu0 %vm4552_vm0, %v4551_v1  ;;  %4064 = vmatprep.subr.bf16.mxu0 %v4551_v1  ;;  %v2477_v63 = vmul.f32 %v4469_v57, %v4979_v58 }
 0xce3   :  { %4060 = vmatprep.mubr.msk.bf16.mxu1 %vm4552_vm0, %v4551_v1  ;;  %4070 = vmatprep.subr.bf16.mxu1 %v4551_v1 }
 0xce4   :  { %v2485_v6 = vpack.c.bf16 %v2477_v63, %v2477_v63 }
 0xce8   :  { %4055 = vmatmul.mubr.msk.bf16.vlgmr.msra.gmra.mxu0 %vm769_vm3, %v2483_v55 }
 0xce9   :  { %4066 = vmatprep.mubr.msk.bf16.mxu0 %vm4552_vm0, %v4551_v1 }
 0xcfe   :  { %v2456_v49 = vpop.xlane.xlu1 %2455 }
 0xcff   :  { %4470 = vrcp.f32 %v2456_v49 }
 0xd02   :  { %v2462_v53 = vpop.xlane.xlu1 %2461 }
 0xd03   :  { %4472 = vrcp.f32 %v2462_v53 }
 0xd06   :  { %v4264_v56 = vpop.permute.xlu1 %4263 }
 0xd07   :  { %v4265_v59 = vunpack.i.l.bf16 %v4264_v56  ;;  %v4266_v60 = vunpack.i.h.bf16 %v4264_v56 }
 0xd09   :  { %v2021_v61 = vpack.c.bf16 %v4265_v59, %v4265_v59  ;;  %v2022_v5 = vpack.c.bf16 %v4266_v60, %v4266_v60 }
 0xd0b   :  { %v2767_v62 = vsel %vm869_vm2, %v2021_v61, 0  ;;  %v2813_v58 = vsel %vm869_vm2, %v2022_v5, 0 }
 0xd0c   :  { %v4471_v0 = vpop.eup %4470  ;;  %4065 = vmatpush3.bf16.msra.mxu0 %v2767_v62 }
 0xd0d   :  { %v2476_v7 = vmul.f32 %v4471_v0, %v4995_v4  ;;  %4076 = vmatprep.subr.bf16.mxu0 %v4551_v1 }
 0xd0f   :  { %4067 = vmatmul.mubr.msk.bf16.vlgmr.msra.gmra.mxu0 %vm769_vm3, %v2485_v6  ;;  %v2484_v8 = vpack.c.bf16 %v2476_v7, %v2476_v7 }
 0xd10   :  { %v4473_v9 = vpop.eup %4472  ;;  %4092 = vmatprep.mubr.msk.bf16.mxu0 %vm4552_vm0, %v4551_v1  ;;  %4077 = vmatpush3.bf16.msra.mxu0 %v4370_v27 }
 0xd11   :  { %4061 = vmatmul.mubr.msk.bf16.vlgmr.msra.gmra.mxu1 %vm769_vm3, %v2484_v8  ;;  %v2478_v10 = vmul.f32 %v4473_v9, %v4999_v20  ;;  %v4371_v20 = vld [vmem:[#allocation2 + $0x2ac] ss:$24 sps:$4 sm:$0xff]   ;;  %4078 = vmatprep.subr.bf16.mxu0 %v4551_v1 }
 0xd12   :  { %4071 = vmatpush3.bf16.msra.mxu1 %v2813_v58  ;;  %4072 = vmatprep.mubr.msk.bf16.mxu1 %vm4552_vm0, %v4551_v1 }
 0xd13   :  { %4096 = vmatprep.subr.bf16.mxu1 %v4551_v1  ;;  %v2486_v13 = vpack.c.bf16 %v2478_v10, %v2478_v10 }
 0xd14   :  { %4079 = vmatpush3.bf16.msra.mxu0 %v4371_v20 }
 0xd15   :  { %4080 = vmatprep.subr.bf16.mxu0 %v4551_v1 }
 0xd18   :  { %4081 = vmatpush3.bf16.msra.mxu0 %v4372_v32 }
 0xd19   :  { %4073 = vmatmul.mubr.msk.bf16.vlgmr.msra.gmra.mxu1 %vm769_vm3, %v2486_v13  ;;  %4082 = vmatprep.subr.bf16.mxu0 %v4551_v1 }
 0xd1a   :  { %4112 = vmatprep.mubr.msk.bf16.mxu1 %vm4552_vm0, %v4551_v1 }
 0xd1c   :  { %4083 = vmatpush3.bf16.msra.mxu0 %v4373_v38 }
 0xd1d   :  { %4084 = vmatprep.subr.bf16.mxu0 %v4551_v1 }
 0xd20   :  { %4085 = vmatpush3.bf16.msra.mxu0 %v4374_v41 }
 0xd21   :  { %v5040_v14 = vpop.f32.mrf.mxu0  ;;  %4086 = vmatprep.subr.bf16.mxu0 %v4551_v1 }
 0xd23   :  { %v4032_v17 = vpop.f32.mrf.mxu0 }
 0xd24   :  { %4087 = vmatpush3.bf16.msra.mxu0 %v4375_v47  ;;  %v4381_v47 = vld [vmem:[#allocation2 + $0x250] ss:$24 sps:$4 sm:$0xff]  }
 0xd25   :  { %v2530_v4 = vpop.f32.mrf.mxu0  ;;  %4088 = vmatprep.subr.bf16.mxu0 %v4551_v1 }
 0xd27   :  { %v4033_v19 = vpop.f32.mrf.mxu0 }
 0xd28   :  { %4089 = vmatpush3.bf16.msra.mxu0 %v4376_v44  ;;  %v4382_v44 = vld [vmem:[#allocation2 + $0x220] ss:$24 sps:$4 sm:$0xff]  }
 0xd29   :  { %v5042_v21 = vpop.f32.mrf.mxu1  ;;  %4090 = vmatprep.subr.bf16.mxu0 %v4551_v1 }
 0xd2b   :  { %v4038_v22 = vpop.f32.mrf.mxu1 }
 0xd2c   :  { %4091 = vmatpush3.bf16.msra.mxu0 %v4377_v52  ;;  %v4386_v52 = vld [vmem:[#allocation2 + $0x2e4] ss:$24 sps:$4 sm:$0xff]  }
 0xd2d   :  { %v2576_v23 = vpop.f32.mrf.mxu1  ;;  %4116 = vmatprep.subr.bf16.mxu0 %v4551_v1 }
 0xd2f   :  { %v4039_v24 = vpop.f32.mrf.mxu1 }
 0xda0   :  { %v2619_v28 = vpop.f32.mrf.mxu0  ;;  %v2665_v29 = vpop.f32.mrf.mxu1 }
 0xda1   :  { %v4267_v34 = vpack.i.bf16 %v2665_v29, %v2619_v28 }
 0xda2   :  { %v4044_v37 = vpop.f32.mrf.mxu0  ;;  %v4050_v36 = vpop.f32.mrf.mxu1 }
 0xda3   :  { %4268 = vrot.lane.b32.xlu0 %v4267_v34, %s4554_s12 }
 0xda4   :  { %v2622_v25 = vpop.f32.mrf.mxu0  ;;  %v2668_v26 = vpop.f32.mrf.mxu1 }
 0xda5   :  { %v4378_v25 = vld [vmem:[#allocation2 + $0x2e0] ss:$24 sps:$4 sm:$0xff]  }
 0xda6   :  { %v4045_v39 = vpop.f32.mrf.mxu0  ;;  %v4051_v40 = vpop.f32.mrf.mxu1  ;;  %4097 = vmatpush3.bf16.msra.mxu1 %v4378_v25 }
 0xda7   :  { %4098 = vmatprep.subr.bf16.mxu1 %v4551_v1 }
 0xda8   :  { %v2711_v43 = vpop.f32.mrf.mxu0 }
 0xdaa   :  { %v4056_v33 = vpop.f32.mrf.mxu0 }
 0xdac   :  { %v2714_v45 = vpop.f32.mrf.mxu0 }
 0xdae   :  { %v4057_v42 = vpop.f32.mrf.mxu0 }
 0xdaf   :  { %v4379_v42 = vld [vmem:[#allocation2 + $0x2b0] ss:$24 sps:$4 sm:$0xff]  }
 0xdb0   :  { %4099 = vmatpush3.bf16.msra.mxu1 %v4379_v42 }
 0xdb1   :  { %4100 = vmatprep.subr.bf16.mxu1 %v4551_v1 }
 0xdcf   :  { %v2803_v51 = vpop.f32.mrf.mxu0 }
 0xdd1   :  { %v2757_v48 = vpop.f32.mrf.mxu1  ;;  %v4068_v54 = vpop.f32.mrf.mxu0 }
 0xdd2   :  { %v4272_v55 = vpack.i.bf16 %v2757_v48, %v2711_v43  ;;  %v4384_v48 = vld [vmem:[#allocation2 + $0x1c0] ss:$24 sps:$4 sm:$0xff]   ;;  %v4385_v54 = vld [vmem:[#allocation2 + $0x190] ss:$24 sps:$4 sm:$0xff]  }
 0xdd3   :  { %v4062_v49 = vpop.f32.mrf.mxu1  ;;  %v2806_v53 = vpop.f32.mrf.mxu0 }
 0xdd4   :  { %4273 = vrot.lane.b32.xlu1 %v4272_v55, %s4548_s28  ;;  %v4387_v55 = vld [vmem:[#allocation2 + $0x2b4] ss:$24 sps:$4 sm:$0xff]   ;;  %v4388_v49 = vld [vmem:[#allocation2 + $0x284] ss:$24 sps:$4 sm:$0xff]  }
 0xdd5   :  { %v2760_v57 = vpop.f32.mrf.mxu1  ;;  %v4069_v56 = vpop.f32.mrf.mxu0  ;;  %v4389_v53 = vld [vmem:[#allocation2 + $0x254] ss:$24 sps:$4 sm:$0xff]  }
 0xdd6   :  { %v4390_v57 = vld [vmem:[#allocation2 + $0x224] ss:$24 sps:$4 sm:$0xff]  }
 0xdd7   :  { %v4063_v59 = vpop.f32.mrf.mxu1 }
 0xdd9   :  { %v2849_v60 = vpop.f32.mrf.mxu1 }
 0xdda   :  { %v4277_v61 = vpack.i.bf16 %v2849_v60, %v2803_v51  ;;  %v4383_v51 = vld [vmem:[#allocation2 + $0x1f0] ss:$24 sps:$4 sm:$0xff]  }
 0xddb   :  { %v4074_v63 = vpop.f32.mrf.mxu1 }
 0xddc   :  { %4278 = vrot.lane.b32.xlu0 %v4277_v61, %s4553_s11 }
 0xddd   :  { %v2852_v62 = vpop.f32.mrf.mxu1 }
 0xddf   :  { %v4075_v0 = vpop.f32.mrf.mxu1 }
 0xe15   :  { %v4269_v5 = vpop.permute.xlu0 %4268 }
 0xe16   :  { %v4271_v7 = vunpack.i.h.bf16 %v4269_v5  ;;  %v4270_v8 = vunpack.i.l.bf16 %v4269_v5 }
 0xe18   :  { %v2880_v13 = vsel %vm400_vm1, %v5042_v21, %v4271_v7  ;;  %v2879_v17 = vsel %vm400_vm1, %v5040_v14, %v4270_v8  ;;  %v2905_v21 = vrot.slane %v4883_v18, %v4801_v3 }
 0xe46   :  { %v4274_v6 = vpop.permute.xlu1 %4273 }
 0xe47   :  { %v4276_v9 = vunpack.i.h.bf16 %v4274_v6  ;;  %v4275_v58 = vunpack.i.l.bf16 %v4274_v6  ;;  %v3022_v6 = vrot.slane %v4883_v18, %v1404_v46  ;;  %v4392_v46 = vld [vmem:[#allocation2 + $0x1c4] ss:$24 sps:$4 sm:$0xff]  }
 0xe49   :  { %v2882_v22 = vsel %vm1261_vm4, %v2880_v13, %v4276_v9  ;;  %v2881_v23 = vsel %vm1261_vm4, %v2879_v17, %v4275_v58  ;;  %v3028_v58 = vrot.slane %v4883_v18, %v1410_v50  ;;  %v3067_v50 = vrot.slane %v4883_v18, %v4836_v2 }
 0xe4e   :  { %v4279_v10 = vpop.permute.xlu0 %4278 }
 0xe4f   :  { %v4281_v4 = vunpack.i.h.bf16 %v4279_v10  ;;  %v4280_v19 = vunpack.i.l.bf16 %v4279_v10 }
 0xe51   :  { %v2884_v24 = vsel %vm1264_vm5, %v2882_v22, %v4281_v4  ;;  %v2883_v27 = vsel %vm1264_vm5, %v2881_v23, %v4280_v19  ;;  %v4391_v19 = vld [vmem:[#allocation2 + $0x1f4] ss:$24 sps:$4 sm:$0xff]  }
 0xe52   :  { %v2901_v20 = vpack.c.bf16 %v2884_v24, %v2883_v27  ;;  %v4393_v22 = vld [vmem:[#allocation2 + $0x194] ss:$24 sps:$4 sm:$0xff]  }
 0xe54   :  { %4093 = vmatmul.mubr.bf16.vlgmr.msra.gmra.mxu0 %v2901_v20 }
 0xe55   :  { %4132 = vmatprep.mubr.msk.bf16.mxu0 %vm4552_vm0, %v4551_v1  ;;  %4117 = vmatpush3.bf16.msra.mxu0 %v4386_v52  ;;  %v3564_v52 = vld [vmem:[%s5125_s2 + $0x18] sm:$0x3] }
 0xe56   :  { %4118 = vmatprep.subr.bf16.mxu0 %v4551_v1 }
 0xe59   :  { %4119 = vmatpush3.bf16.msra.mxu0 %v4387_v55  ;;  %v3280_v55 = vrot.slane %v3564_v52, %v4629_v35 }
 0xe5a   :  { %4120 = vmatprep.subr.bf16.mxu0 %v4551_v1 }
 0xe5d   :  { %4121 = vmatpush3.bf16.msra.mxu0 %v4388_v49 }
 0xe5e   :  { %4122 = vmatprep.subr.bf16.mxu0 %v4551_v1 }
 0xe61   :  { %4123 = vmatpush3.bf16.msra.mxu0 %v4389_v53 }
 0xe62   :  { %4124 = vmatprep.subr.bf16.mxu0 %v4551_v1 }
 0xe65   :  { %4125 = vmatpush3.bf16.msra.mxu0 %v4390_v57  ;;  %v3286_v57 = vrot.slane %v3564_v52, %v4619_v31 }
 0xe66   :  { %4126 = vmatprep.subr.bf16.mxu0 %v4551_v1 }
 0xe69   :  { %4127 = vmatpush3.bf16.msra.mxu0 %v4391_v19  ;;  %v4397_v19 = vld [vmem:[#allocation4 + $0x20] sm:$0xff]  }
 0xe6a   :  { %4128 = vmatprep.subr.bf16.mxu0 %v4551_v1 }
 0xe6d   :  { %4129 = vmatpush3.bf16.msra.mxu0 %v4392_v46  ;;  %v4398_v46 = vld [vmem:[#allocation4 + $0x18] sm:$0xff]  }
 0xe6e   :  { %4130 = vmatprep.subr.bf16.mxu0 %v4551_v1 }
 0xe71   :  { %4131 = vmatpush3.bf16.msra.mxu0 %v4393_v22  ;;  %v4399_v22 = vld [vmem:[#allocation4 + $0x10] sm:$0xff]  }
 0xf14   :  { %v2988_v32 = vpop.f32.mrf.mxu0 }
 0xf15   :  { %v2989_v14 = vadd.f32 %v2988_v32, %v2905_v21 }
 0xf16   :  { %v4094_v28 = vpop.f32.mrf.mxu0 }
 0xf17   :  { %v2995_v29 = vadd.f32 %v2989_v14, %v4870_v15 }
 0xf18   :  { %v2991_v34 = vpop.f32.mrf.mxu0 }
 0xf19   :  { %v2992_v37 = vadd.f32 %v2991_v34, %v2905_v21  ;;  %2997 = vadd.xlane.f32.xlu1 %v2995_v29  ;;  %v3163_v34 = vrot.slane %v4883_v18, %v1545_v11 }
 0xf1a   :  { %v4095_v36 = vpop.f32.mrf.mxu0 }
 0xf1b   :  { %v2996_v38 = vadd.f32 %v2992_v37, %v4872_v16  ;;  %v4380_v16 = vld [vmem:[#allocation2 + $0x280] ss:$24 sps:$4 sm:$0xff]  }
 0xf1c   :  { %4101 = vmatpush3.bf16.msra.mxu1 %v4380_v16 }
 0xf1d   :  { %2999 = vadd.xlane.f32.xlu0 %v2996_v38  ;;  %4102 = vmatprep.subr.bf16.mxu1 %v4551_v1 }
 0xf20   :  { %4103 = vmatpush3.bf16.msra.mxu1 %v4381_v47 }
 0xf21   :  { %4104 = vmatprep.subr.bf16.mxu1 %v4551_v1 }
 0xf24   :  { %4105 = vmatpush3.bf16.msra.mxu1 %v4382_v44 }
 0xf25   :  { %4106 = vmatprep.subr.bf16.mxu1 %v4551_v1 }
 0xf28   :  { %4107 = vmatpush3.bf16.msra.mxu1 %v4383_v51 }
 0xf29   :  { %4108 = vmatprep.subr.bf16.mxu1 %v4551_v1 }
 0xf2c   :  { %4109 = vmatpush3.bf16.msra.mxu1 %v4384_v48 }
 0xf2d   :  { %4110 = vmatprep.subr.bf16.mxu1 %v4551_v1 }
 0xf30   :  { %4111 = vmatpush3.bf16.msra.mxu1 %v4385_v54 }
 0xf31   :  { %4136 = vmatprep.subr.bf16.mxu1 %v4551_v1 }
 0xfa2   :  { %v2998_v26 = vpop.xlane.xlu1 %2997 }
 0xfa3   :  { %v3001_v39 = vmul.f32 0.0078125, %v2998_v26 }
 0xfa5   :  { %v3003_v40 = vsub.f32 %v2995_v29, %v3001_v39 }
 0xfa6   :  { %v3000_v41 = vpop.xlane.xlu0 %2999 }
 0xfa7   :  { %v3002_v43 = vmul.f32 0.0078125, %v3000_v41  ;;  %v3005_v33 = vmul.f32 %v3003_v40, %v3003_v40 }
 0xfa9   :  { %v3004_v45 = vsub.f32 %v2996_v38, %v3002_v43  ;;  %3007 = vadd.xlane.f32.xlu0 %v3005_v33 }
 0xfab   :  { %v3006_v15 = vmul.f32 %v3004_v45, %v3004_v45 }
 0xfad   :  { %3009 = vadd.xlane.f32.xlu1 %v3006_v15 }
0x1032   :  { %v3008_v56 = vpop.xlane.xlu0 %3007 }
0x1033   :  { %v3011_v59 = vmul.f32 0.0078125, %v3008_v56 }
0x1035   :  { %v3013_v60 = vadd.f32 1e-05, %v3011_v59 }
0x1036   :  { %v3010_v61 = vpop.xlane.xlu1 %3009 }
0x1037   :  { %4474 = vrsqrt.f32 %v3013_v60  ;;  %v3012_v63 = vmul.f32 0.0078125, %v3010_v61 }
0x1039   :  { %v3014_v62 = vadd.f32 1e-05, %v3012_v63 }
0x103b   :  { %4476 = vrsqrt.f32 %v3014_v62 }
0x1044   :  { %v4475_v0 = vpop.eup %4474 }
0x1045   :  { %v3017_v5 = vmul.f32 %v4475_v0, %v3003_v40  ;;  %v4394_v0 = vld [vmem:[#allocation4 + $0x38] sm:$0xff]  }
0x1047   :  { %v3023_v9 = vmul.f32 %v3022_v6, %v3017_v5 }
0x1048   :  { %v4477_v7 = vpop.eup %4476 }
0x1049   :  { %v3018_v8 = vmul.f32 %v4477_v7, %v3004_v45  ;;  %v3029_v13 = vadd.f32 %v3028_v58, %v3023_v9 }
0x104b   :  { %v3024_v10 = vmul.f32 %v3022_v6, %v3018_v8 }
0x104d   :  { %v3030_v17 = vadd.f32 %v3028_v58, %v3024_v10 }
0x104f   :  { %v3063_v4 = vpack.c.bf16 %v3030_v17, %v3029_v13 }
0x1051   :  { %4113 = vmatmul.mubr.bf16.vlgmr.msra.gmra.mxu1 %v3063_v4  ;;  %v4396_v4 = vld [vmem:[#allocation4 + $0x28] sm:$0xff]  }
0x1052   :  { %4152 = vmatprep.mubr.msk.bf16.mxu1 %vm4552_vm0, %v4551_v1  ;;  %4137 = vmatpush3.bf16.msra.mxu1 %v4394_v0 }
0x1053   :  { %4138 = vmatprep.subr.bf16.mxu1 %v4551_v1 }
0x1111   :  { %v3150_v23 = vpop.f32.mrf.mxu1 }
0x1112   :  { %v3151_v27 = vadd.f32 %v3150_v23, %v3067_v50  ;;  %v4401_v23 = vld [vmem:[#allocation4] sm:$0xff]  }
0x1113   :  { %v4114_v24 = vpop.f32.mrf.mxu1 }
0x1114   :  { %v3157_v14 = vmax.f32 %v3151_v27, 0.0 }
0x1115   :  { %v3153_v20 = vpop.f32.mrf.mxu1 }
0x1116   :  { %v3154_v21 = vadd.f32 %v3153_v20, %v3067_v50  ;;  %v4400_v50 = vld [vmem:[#allocation4 + $0x8] sm:$0xff]  }
0x1117   :  { %v4115_v32 = vpop.f32.mrf.mxu1 }
0x1118   :  { %v3158_v28 = vmax.f32 %v3154_v21, 0.0 }
0x111a   :  { %v3159_v29 = vpack.c.bf16 %v3158_v28, %v3157_v14  ;;  %v3289_v28 = vld [vmem:[%s5127_s4] sm:$0xff] }
0x111c   :  { %4133 = vmatmul.mubr.bf16.vlgmr.msra.gmra.mxu0 %v3159_v29 }
0x11dc   :  { %v3246_v37 = vpop.f32.mrf.mxu0 }
0x11dd   :  { %v3247_v36 = vadd.f32 %v3246_v37, %v3163_v34  ;;  %v3315_v37 = vrot.slane %v3289_v28, %v4629_v35 }
0x11de   :  { %v4134_v38 = vpop.f32.mrf.mxu0 }
0x11df   :  { %v3253_v25 = vadd.f32 %v3247_v36, %v3029_v13 }
0x11e0   :  { %v3249_v26 = vpop.f32.mrf.mxu0 }
0x11e1   :  { %v3250_v39 = vadd.f32 %v3249_v26, %v3163_v34  ;;  %3255 = vadd.xlane.f32.xlu0 %v3253_v25 }
0x11e2   :  { %v4135_v40 = vpop.f32.mrf.mxu0 }
0x11e3   :  { %v3254_v41 = vadd.f32 %v3250_v39, %v3030_v17  ;;  %v4395_v17 = vld [vmem:[#allocation4 + $0x30] sm:$0xff]  }
0x11e4   :  { %4139 = vmatpush3.bf16.msra.mxu1 %v4395_v17 }
0x11e5   :  { %3257 = vadd.xlane.f32.xlu1 %v3254_v41  ;;  %4140 = vmatprep.subr.bf16.mxu1 %v4551_v1 }
0x11e8   :  { %4141 = vmatpush3.bf16.msra.mxu1 %v4396_v4 }
0x11e9   :  { %4142 = vmatprep.subr.bf16.mxu1 %v4551_v1 }
0x11ec   :  { %4143 = vmatpush3.bf16.msra.mxu1 %v4397_v19 }
0x11ed   :  { %4144 = vmatprep.subr.bf16.mxu1 %v4551_v1 }
0x11f0   :  { %4145 = vmatpush3.bf16.msra.mxu1 %v4398_v46 }
0x11f1   :  { %4146 = vmatprep.subr.bf16.mxu1 %v4551_v1 }
0x11f4   :  { %4147 = vmatpush3.bf16.msra.mxu1 %v4399_v22 }
0x11f5   :  { %4148 = vmatprep.subr.bf16.mxu1 %v4551_v1 }
0x11f8   :  { %4149 = vmatpush3.bf16.msra.mxu1 %v4400_v50 }
0x11f9   :  { %4150 = vmatprep.subr.bf16.mxu1 %v4551_v1 }
0x11fc   :  { %4151 = vmatpush3.bf16.msra.mxu1 %v4401_v23 }
0x126a   :  { %v3256_v43 = vpop.xlane.xlu0 %3255 }
0x126b   :  { %v3259_v33 = vmul.f32 0.0078125, %v3256_v43  ;;  %v3344_v43 = vrot.slane %v3289_v28, %v4654_v12 }
0x126d   :  { %v3261_v45 = vsub.f32 %v3253_v25, %v3259_v33  ;;  %v3321_v25 = vrot.slane %v3289_v28, %v4619_v31 }
0x126e   :  { %v3258_v15 = vpop.xlane.xlu1 %3257 }
0x126f   :  { %v3260_v42 = vmul.f32 0.0078125, %v3258_v15  ;;  %v3263_v16 = vmul.f32 %v3261_v45, %v3261_v45 }
0x1271   :  { %v3262_v47 = vsub.f32 %v3254_v41, %v3260_v42  ;;  %3265 = vadd.xlane.f32.xlu0 %v3263_v16 }
0x1273   :  { %v3264_v30 = vmul.f32 %v3262_v47, %v3262_v47 }
0x1275   :  { %3267 = vadd.xlane.f32.xlu1 %v3264_v30 }
0x12fa   :  { %v3266_v11 = vpop.xlane.xlu0 %3265 }
0x12fb   :  { %v3269_v18 = vmul.f32 0.0078125, %v3266_v11 }
0x12fd   :  { %v3271_v44 = vadd.f32 1e-05, %v3269_v18 }
0x12fe   :  { %v3268_v51 = vpop.xlane.xlu1 %3267 }
0x12ff   :  { %4478 = vrsqrt.f32 %v3271_v44  ;;  %v3270_v48 = vmul.f32 0.0078125, %v3268_v51 }
0x1301   :  { %v3272_v54 = vadd.f32 1e-05, %v3270_v48 }
0x1303   :  { %4480 = vrsqrt.f32 %v3272_v54 }
0x130c   :  { %v4479_v49 = vpop.eup %4478 }
0x130d   :  { %v3275_v53 = vmul.f32 %v4479_v49, %v3261_v45 }
0x130f   :  { %v3281_v56 = vmul.f32 %v3280_v55, %v3275_v53 }
0x1310   :  { %v4481_v59 = vpop.eup %4480 }
0x1311   :  { %v3287_v60 = vadd.f32 %v3286_v57, %v3281_v56  ;;  %v3276_v61 = vmul.f32 %v4481_v59, %v3262_v47 }
0x1313   :  { %3290 = vadd.xlane.f32.xlu0 %v3287_v60  ;;  %v3282_v63 = vmul.f32 %v3280_v55, %v3276_v61 }
0x1315   :  { %v3288_v62 = vadd.f32 %v3286_v57, %v3282_v63  ;;  %v3465_v63 = vrot.slane %v3289_v28, %v4801_v3 }
0x1317   :  { %3292 = vadd.xlane.f32.xlu1 %v3288_v62 }
0x139c   :  { %v3291_v5 = vpop.xlane.xlu0 %3290 }
0x139d   :  { %v3294_v6 = vmul.f32 0.0078125, %v3291_v5 }
0x139f   :  { %v3296_v7 = vsub.f32 %v3287_v60, %v3294_v6 }
0x13a0   :  { %v3293_v8 = vpop.xlane.xlu1 %3292 }
0x13a1   :  { %v3295_v9 = vmul.f32 0.0078125, %v3293_v8  ;;  %v3298_v58 = vmul.f32 %v3296_v7, %v3296_v7 }
0x13a3   :  { %v3297_v10 = vsub.f32 %v3288_v62, %v3295_v9  ;;  %3300 = vadd.xlane.f32.xlu0 %v3298_v58  ;;  %v3475_v58 = vrot.slane %v3289_v28, %v4836_v2 }
0x13a5   :  { %v3299_v13 = vmul.f32 %v3297_v10, %v3297_v10 }
0x13a7   :  { %3302 = vadd.xlane.f32.xlu1 %v3299_v13 }
0x142c   :  { %v3301_v24 = vpop.xlane.xlu0 %3300 }
0x142d   :  { %v3304_v27 = vmul.f32 0.0078125, %v3301_v24 }
0x142f   :  { %v3306_v20 = vadd.f32 1e-05, %v3304_v27 }
0x1430   :  { %v3303_v21 = vpop.xlane.xlu1 %3302 }
0x1431   :  { %4482 = vrsqrt.f32 %v3306_v20  ;;  %v3305_v32 = vmul.f32 0.0078125, %v3303_v21 }
0x1433   :  { %v3307_v14 = vadd.f32 1e-05, %v3305_v32 }
0x1435   :  { %4484 = vrsqrt.f32 %v3307_v14 }
0x143e   :  { %v4483_v29 = vpop.eup %4482 }
0x143f   :  { %v3310_v34 = vmul.f32 %v4483_v29, %v3296_v7 }
0x1441   :  { %v3316_v1 = vmul.f32 %v3315_v37, %v3310_v34 }
0x1442   :  { %v4485_v36 = vpop.eup %4484 }
0x1443   :  { %v3311_v38 = vmul.f32 %v4485_v36, %v3297_v10  ;;  %v3322_v39 = vadd.f32 %v3321_v25, %v3316_v1 }
0x1445   :  { %v3317_v26 = vmul.f32 %v3315_v37, %v3311_v38 }
0x1447   :  { %v3323_v40 = vadd.f32 %v3321_v25, %v3317_v26 }
0x1449   :  { %v3324_v41 = vpack.c.bf16 %v3323_v40, %v3322_v39 }
0x144b   :  { %4153 = vmatmul.mubr.bf16.vlgmr.msra.gmra.mxu1 %v3324_v41 }
0x150b   :  { %v3427_v33 = vpop.f32.mrf.mxu1 }
0x150c   :  { %v3428_v45 = vadd.f32 %v3427_v33, %v3344_v43 }
0x150d   :  { %v4154_v15 = vpop.f32.mrf.mxu1 }
0x150e   :  { %v3434_v42 = vmax.f32 %v3428_v45, 0.0 }
0x150f   :  { %v3430_v16 = vpop.f32.mrf.mxu1 }
0x1510   :  { %v3431_v47 = vadd.f32 %v3430_v16, %v3344_v43  ;;  %3436 = vadd.xlane.f32.xlu0 %v3434_v42 }
0x1511   :  { %v4155_v35 = vpop.f32.mrf.mxu1 }
0x1512   :  { %v3435_v30 = vmax.f32 %v3431_v47, 0.0 }
0x1514   :  { %3438 = vadd.xlane.f32.xlu1 %v3435_v30 }
0x1599   :  { %v3437_v11 = vpop.xlane.xlu0 %3436 }
0x159a   :  { %v3440_v18 = vmul.f32 0.0078125, %v3437_v11 }
0x159c   :  { %v3442_v31 = vsub.f32 %v3434_v42, %v3440_v18 }
0x159d   :  { %v3439_v44 = vpop.xlane.xlu1 %3438 }
0x159e   :  { %v3441_v51 = vmul.f32 0.0078125, %v3439_v44  ;;  %v3444_v48 = vmul.f32 %v3442_v31, %v3442_v31 }
0x15a0   :  { %v3443_v54 = vsub.f32 %v3435_v30, %v3441_v51  ;;  %3446 = vadd.xlane.f32.xlu0 %v3444_v48 }
0x15a2   :  { %v3445_v52 = vmul.f32 %v3443_v54, %v3443_v54 }
0x15a4   :  { %3448 = vadd.xlane.f32.xlu1 %v3445_v52 }
0x1629   :  { %v3447_v12 = vpop.xlane.xlu0 %3446 }
0x162a   :  { %v3450_v55 = vmul.f32 0.0078125, %v3447_v12 }
0x162c   :  { %v3452_v49 = vadd.f32 1e-05, %v3450_v55 }
0x162d   :  { %v3449_v53 = vpop.xlane.xlu1 %3448 }
0x162e   :  { %4486 = vrsqrt.f32 %v3452_v49  ;;  %v3451_v57 = vmul.f32 0.0078125, %v3449_v53 }
0x1630   :  { %v3453_v56 = vadd.f32 1e-05, %v3451_v57 }
0x1632   :  { %4488 = vrsqrt.f32 %v3453_v56 }
0x163b   :  { %v4487_v59 = vpop.eup %4486 }
0x163c   :  { %v3456_v60 = vmul.f32 %v4487_v59, %v3442_v31 }
0x163e   :  { %v3458_v61 = vmul.f32 %v3456_v60, %v3315_v37 }
0x163f   :  { %v4489_v62 = vpop.eup %4488 }
0x1640   :  { %v3460_v0 = vadd.f32 %v3458_v61, %v3321_v25  ;;  %v3457_v5 = vmul.f32 %v4489_v62, %v3443_v54 }
0x1642   :  { %v3466_v6 = vmul.f32 %v3465_v63, %v3460_v0  ;;  %v3459_v7 = vmul.f32 %v3457_v5, %v3315_v37 }
0x1644   :  { %3468 = vadd.xlane.f32.xlu0 %v3466_v6  ;;  %v3461_v8 = vadd.f32 %v3459_v7, %v3321_v25 }
0x1646   :  { %v3467_v9 = vmul.f32 %v3465_v63, %v3461_v8 }
0x1648   :  { %3470 = vadd.xlane.f32.xlu1 %v3467_v9 }
0x16cd   :  { %v3469_v10 = vpop.xlane.xlu0 %3468 }
0x16ce   :  { %v3476_v13 = vadd.f32 %v3475_v58, %v3469_v10 }
0x16d0   :  { %v3637_v17 = vmul.f32 -1.442695, %v3476_v13 }
0x16d1   :  { %v3471_v4 = vpop.xlane.xlu1 %3470 }
0x16d2   :  { %4490 = vpow2.f32 %v3637_v17  ;;  %v3477_v19 = vadd.f32 %v3475_v58, %v3471_v4 }
0x16d4   :  { %v3638_v46 = vmul.f32 -1.442695, %v3477_v19 }
0x16d6   :  { %4492 = vpow2.f32 %v3638_v46 }
0x16df   :  { %v4491_v3 = vpop.eup %4490 }
0x16e0   :  { %v3484_v22 = vadd.f32 1.0, %v4491_v3 }
0x16e2   :  { %4494 = vrcp.f32 %v3484_v22 }
0x16e3   :  { %v4493_v50 = vpop.eup %4492 }
0x16e4   :  { %v3485_v23 = vadd.f32 1.0, %v4493_v50 }
0x16e6   :  { %4496 = vrcp.f32 %v3485_v23 }
0x16ef   :  { %v4495_v24 = vpop.eup %4494 }
0x16f0   :  { %3491 = vst.msk [vmem:[%s5128_s5] sm:$0xff] %vm3490_vm6, %v4495_v24 }
0x16f3   :  { %v4497_v2 = vpop.eup %4496 }
0x16f4   :  { %3492 = vst.msk [vmem:[%s5128_s5 + $0x8] sm:$0xff] %vm3490_vm6, %v4497_v2 }
0x16f5   :  { %3497 = vsyncpa [#allocation3], 1 }
0x16f6   :  { %3498 = vsyncpa [#allocation5], 1 }

</bundles_post_ra>
